<compile_context>
chip_gen: v5e
topology: v5e:2x2
jax: 0.10.0
libtpu: 0.0.40
codegen_flags: <defaults>
</compile_context>

<pallas_src>
import functools

import jax
import jax.numpy as jnp
from jax import lax
from jax.experimental import pallas as pl
from jax.experimental.pallas import tpu as pltpu


# ---------------------------------------------------------------------------
# Fused Pallas kernel: QKV projection -> attention (all heads) -> projection
# ---------------------------------------------------------------------------
def _fused_mha_kernel(x_ref, wqkv_ref, bqkv_ref, wproj_ref, bproj_ref, o_ref, *,
                      block_b, seq_len, num_heads, head_dim, scaling, compute_dtype):
    E = num_heads * head_dim
    M = block_b * seq_len                                    # folded matmul M dim

    # ---- QKV projection: (M, E) @ (E, 3E) + (1, 3E); one big MXU matmul,
    #      f32 accumulate.  Weights arrive already in compute_dtype.
    x = x_ref[...].reshape(M, E).astype(compute_dtype)
    qkv = (jnp.dot(x, wqkv_ref[...], preferred_element_type=jnp.float32)
           + bqkv_ref[...])                                  # (M, 3E) f32 value
    qkv_c = qkv.astype(compute_dtype)                        # matmul operand dtype

    # ---- Attention, all heads per grid step.  Q | K | V are contiguous thirds
    #      (weights de-interleaved at init), each head a static lane slice of the
    #      VALUE — no VMEM scratch round trips, no masked scratch loads/stores.
    ctx_parts = []
    for h in range(num_heads):
        lo = h * head_dim
        q_h = qkv_c[:, lo:lo + head_dim]                     # (M, D)
        k_h = qkv_c[:, E + lo:E + lo + head_dim]             # (M, D)
        v_h = qkv_c[:, 2 * E + lo:2 * E + lo + head_dim]     # (M, D)

        if block_b == 1:
            # 2-D MXU matmuls, contracting on d (no materialized k^T).
            energy = lax.dot_general(q_h, k_h, (((1,), (1,)), ((), ())),
                                     preferred_element_type=jnp.float32)   # (N, N)
            m = jnp.max(energy, axis=-1, keepdims=True)
            e = jnp.exp(energy - m)
            # softmax THEN /sqrt(E) (PyTorch quirk), folded into one reciprocal.
            inv = pl.reciprocal(jnp.sum(e, axis=-1, keepdims=True) * scaling,
                                approx=False)                # approx=True on v6e/v7x
            att = (e * inv).astype(compute_dtype)
            ctx_h = jnp.dot(att, v_h, preferred_element_type=jnp.float32)  # (N, D)
        else:
            # Leading-dim split M -> (block_b, N) is layout-preserving; batched
            # dot_general over the block_b batch axis (flash-attention pattern).
            q3 = q_h.reshape(block_b, seq_len, head_dim)
            k3 = k_h.reshape(block_b, seq_len, head_dim)
            v3 = v_h.reshape(block_b, seq_len, head_dim)
            energy = jnp.einsum('bqd,bkd->bqk', q3, k3,
                                preferred_element_type=jnp.float32)        # (b, N, N)
            m = jnp.max(energy, axis=-1, keepdims=True)
            e = jnp.exp(energy - m)
            inv = pl.reciprocal(jnp.sum(e, axis=-1, keepdims=True) * scaling,
                                approx=False)
            att = (e * inv).astype(compute_dtype)
            ctx_h = jnp.einsum('bqk,bkd->bqd', att, v3,
                               preferred_element_type=jnp.float32
                               ).reshape(M, head_dim)                      # (M, D)
        ctx_parts.append(ctx_h)

    # One lane-dense 'b n (h d)' context value feeds the projection dot directly.
    ctx = jnp.concatenate(ctx_parts, axis=-1).astype(compute_dtype)        # (M, E)

    # ---- Output projection: (M, E) @ (E, E) + (1, E).
    y = jnp.dot(ctx, wproj_ref[...], preferred_element_type=jnp.float32) + bproj_ref[...]
    o_ref[...] = y.reshape(block_b, seq_len, E).astype(o_ref.dtype)


def _pick_block_b(batch, seq_len, target_rows=256):
    """Largest divisor of `batch` with block_b*seq_len <= target_rows, preferring to
    keep >= 2 grid steps so v7x's two TensorCores both get work."""
    divisors = [d for d in range(1, batch + 1) if batch % d == 0]
    fits = [d for d in divisors if d * seq_len <= target_rows]
    if not fits:
        return 1
    multi_step = [d for d in fits if batch // d >= 2]
    return max(multi_step) if multi_step else max(fits)


def fused_mha(x, w_qkv, b_qkv, w_proj, b_proj, *, num_heads, scaling,
              compute_dtype=jnp.float32, block_b=None):
    """x: (B, N, E); w_qkv: (E, 3E) de-interleaved; w_proj: (E, E). Returns (B, N, E)."""
    B, N, E = x.shape
    D = E // num_heads
    if block_b is None:
        block_b = _pick_block_b(B, N)
    assert B % block_b == 0

    kernel = functools.partial(
        _fused_mha_kernel,
        block_b=block_b, seq_len=N, num_heads=num_heads, head_dim=D,
        scaling=scaling, compute_dtype=compute_dtype)

    return pl.pallas_call(
        kernel,
        out_shape=jax.ShapeDtypeStruct((B, N, E), x.dtype),
        grid=(B // block_b,),
        in_specs=[
            pl.BlockSpec((block_b, N, E), lambda b: (b, 0, 0)),   # x: block_b batches/step
            pl.BlockSpec((E, 3 * E), lambda b: (0, 0)),           # weights: same block
            pl.BlockSpec((1, 3 * E), lambda b: (0, 0)),           #   every step -> DMA'd once
            pl.BlockSpec((E, E), lambda b: (0, 0)),
            pl.BlockSpec((1, E), lambda b: (0, 0)),
        ],
        out_specs=pl.BlockSpec((block_b, N, E), lambda b: (b, 0, 0)),
        compiler_params=pltpu.CompilerParams(
            dimension_semantics=("parallel",)),
        # NOTE: for real ViT shapes (E=768, large block_b) re-budget VMEM explicitly
        # on v7x (64 MiB physical) via vmem_limit_bytes=...
    )(x, w_qkv, b_qkv.reshape(1, 3 * E), w_proj, b_proj.reshape(1, E))


# ---------------------------------------------------------------------------
# Module wrapper (parameter setup; de-interleave + pre-cast QKV weights at init)
# ---------------------------------------------------------------------------
class MultiHeadAttentionPallas:
    def __init__(self, emb_size=64, num_heads=8, dropout=0.0, key=None,
                 compute_dtype=jnp.float32):
        assert emb_size % num_heads == 0
        self.emb_size = emb_size
        self.num_heads = num_heads
        self.head_dim = emb_size // num_heads
        self.compute_dtype = compute_dtype  # use jnp.bfloat16 on v6e/v7x for MXU speed
        if key is None:
            key = jax.random.PRNGKey(0)
        k1, k2, k3, k4 = jax.random.split(key, 4)
        bound = 1.0 / (emb_size ** 0.5)  # torch.nn.Linear default init bound

        # Torch-equivalent (interleaved) parameters, stored transposed: (E, 3E).
        self.w_qkv_raw = jax.random.uniform(k1, (emb_size, 3 * emb_size),
                                            jnp.float32, -bound, bound)
        self.b_qkv_raw = jax.random.uniform(k2, (3 * emb_size,),
                                            jnp.float32, -bound, bound)
        # De-interleave columns once:  original col = h*(D*3) + d*3 + s  (einops
        # 'b n (h d qkv)')  ->  new col = s*E + h*D + d  (contiguous Q | K | V,
        # each in (h, d) order).  Makes the runtime q/k/v split free slices.
        D = self.head_dim
        idx = jnp.arange(3 * emb_size)
        s = idx // emb_size
        rem = idx % emb_size
        h = rem // D
        d = rem % D
        perm = h * (D * 3) + d * 3 + s
        self.w_qkv = self.w_qkv_raw[:, perm]
        self.b_qkv = self.b_qkv_raw[perm]

        # nn.Linear(E, E), stored transposed: (E, E).
        self.w_proj = jax.random.uniform(k3, (emb_size, emb_size),
                                         jnp.float32, -bound, bound)
        self.b_proj = jax.random.uniform(k4, (emb_size,),
                                         jnp.float32, -bound, bound)

        # Pre-cast weights once (grid-invariant data never re-cast inside the kernel).
        self.w_qkv_c = self.w_qkv.astype(compute_dtype)
        self.w_proj_c = self.w_proj.astype(compute_dtype)

    def __call__(self, x, mask=None):
        # TODO(synk): mask ignored — upstream PyTorch uses non-in-place mask_fill and
        # drops the result, so masking is a no-op; dropout p=0 is identity.
        scaling = self.emb_size ** 0.5
        return fused_mha(x, self.w_qkv_c, self.b_qkv, self.w_proj_c, self.b_proj,
                         num_heads=self.num_heads, scaling=scaling,
                         compute_dtype=self.compute_dtype)


# ---------------------------------------------------------------------------
# Pure-JAX reference (semantics of the PyTorch forward, using the RAW
# interleaved weights — also validates the de-interleave permutation).
# ---------------------------------------------------------------------------
def ref_forward(m, x):
    B, N, E = x.shape
    H, D = m.num_heads, m.head_dim
    qkv = x @ m.w_qkv_raw + m.b_qkv_raw                       # interleaved, like torch
    qkv = jnp.transpose(qkv.reshape(B, N, H, D, 3), (4, 0, 2, 1, 3))
    q, k, v = qkv[0], qkv[1], qkv[2]
    energy = jnp.einsum('bhqd,bhkd->bhqk', q, k)
    att = jax.nn.softmax(energy, axis=-1) / (E ** 0.5)
    out = jnp.einsum('bhal,bhlv->bhav', att, v)
    out = jnp.transpose(out, (0, 2, 1, 3)).reshape(B, N, E)
    return out @ m.w_proj + m.b_proj


if __name__ == "__main__":
    key = jax.random.PRNGKey(0)
    kx, kp = jax.random.split(key)

    B, N, E, H = 2, 16, 64, 8  # small shapes consistent with the module
    x = jax.random.normal(kx, (B, N, E), dtype=jnp.float32)

    mha = MultiHeadAttentionPallas(emb_size=E, num_heads=H, dropout=0.0, key=kp)

    # Default path: block_b chosen to keep >= 2 parallel grid steps (v7x 2-TC friendly).
    y = mha(x)
    jax.block_until_ready(y)

    y_ref = ref_forward(mha, x)
    assert y.shape == (B, N, E)
    assert jnp.allclose(y, y_ref, atol=1e-5, rtol=1e-5), "mismatch vs reference"

    # Also exercise the batch-folded projection path (block_b > 1 -> M = block_b*N rows).
    y2 = fused_mha(x, mha.w_qkv_c, mha.b_qkv, mha.w_proj_c, mha.b_proj,
                   num_heads=H, scaling=E ** 0.5, block_b=2)
    jax.block_until_ready(y2)
    assert jnp.allclose(y2, y_ref, atol=1e-5, rtol=1e-5), "mismatch vs reference (block_b=2)"

    print("KERNEL_OK")
</pallas_src>

<mosaic_0001>
module attributes {stable_mosaic.version = 11 : i64} {
  func.func @_fused_mha_kernel(%arg0: i32, %arg1: memref<1x16x64xf32, #tpu.memory_space<vmem>>, %arg2: memref<64x192xf32, #tpu.memory_space<vmem>>, %arg3: memref<1x192xf32, #tpu.memory_space<vmem>>, %arg4: memref<64x64xf32, #tpu.memory_space<vmem>>, %arg5: memref<1x64xf32, #tpu.memory_space<vmem>>, %arg6: memref<1x16x64xf32, #tpu.memory_space<vmem>>) attributes {dimension_semantics = [#tpu.dimension_semantics<parallel>], iteration_bounds = array<i64: 2>, scalar_prefetch = 0 : i64, scratch_operands = 0 : i64, tpu.core_type = #tpu.core_type<tc>, window_params = [{transform_indices = @transform_0, window_bounds = array<i64: 1, 16, 64>}, {pipeline_mode = #tpu.pipeline_mode<synchronous>, transform_indices = @transform_1, window_bounds = array<i64: 64, 192>}, {pipeline_mode = #tpu.pipeline_mode<synchronous>, transform_indices = @transform_2, window_bounds = array<i64: 1, 192>}, {pipeline_mode = #tpu.pipeline_mode<synchronous>, transform_indices = @transform_3, window_bounds = array<i64: 64, 64>}, {pipeline_mode = #tpu.pipeline_mode<synchronous>, transform_indices = @transform_4, window_bounds = array<i64: 1, 64>}, {transform_indices = @transform_5, window_bounds = array<i64: 1, 16, 64>}]} {
    %c0 = arith.constant 0 : index
    %c0_0 = arith.constant 0 : index
    %c0_1 = arith.constant 0 : index
    %0 = vector.load %arg1[%c0, %c0_0, %c0_1] : memref<1x16x64xf32, #tpu.memory_space<vmem>>, vector<1x16x64xf32>
    %1 = vector.shape_cast %0 : vector<1x16x64xf32> to vector<16x64xf32>
    %c0_2 = arith.constant 0 : index
    %c0_3 = arith.constant 0 : index
    %2 = vector.load %arg2[%c0_2, %c0_3] : memref<64x192xf32, #tpu.memory_space<vmem>>, vector<64x192xf32>
    %cst = arith.constant dense<0.000000e+00> : vector<16x192xf32>
    %3 = tpu.matmul %1, %2, %cst {dimension_numbers = #tpu.dot_dimension_numbers<[1], [0], [0], [1], [0, 0, 1, 1], [], []>} : vector<16x64xf32>, vector<64x192xf32>, vector<16x192xf32> -> vector<16x192xf32>
    %c0_4 = arith.constant 0 : index
    %c0_5 = arith.constant 0 : index
    %4 = vector.load %arg3[%c0_4, %c0_5] : memref<1x192xf32, #tpu.memory_space<vmem>>, vector<1x192xf32>
    %5 = vector.broadcast %4 : vector<1x192xf32> to vector<16x192xf32>
    %6 = arith.addf %3, %5 : vector<16x192xf32>
    %7 = vector.extract_strided_slice %6 {offsets = [0, 0], sizes = [16, 8], strides = [1, 1]} : vector<16x192xf32> to vector<16x8xf32>
    %8 = vector.extract_strided_slice %6 {offsets = [0, 64], sizes = [16, 8], strides = [1, 1]} : vector<16x192xf32> to vector<16x8xf32>
    %9 = vector.extract_strided_slice %6 {offsets = [0, 128], sizes = [16, 8], strides = [1, 1]} : vector<16x192xf32> to vector<16x8xf32>
    %cst_6 = arith.constant dense<0.000000e+00> : vector<16x16xf32>
    %10 = tpu.matmul %7, %8, %cst_6 {dimension_numbers = #tpu.dot_dimension_numbers<[1], [1], [0], [0], [0, 0, 1, 0], [], []>} : vector<16x8xf32>, vector<16x8xf32>, vector<16x16xf32> -> vector<16x16xf32>
    %cst_7 = arith.constant dense<0xFF800000> : vector<16xf32>
    %11 = vector.multi_reduction <maximumf>, %10, %cst_7 [1] : vector<16x16xf32> to vector<16xf32>
    %12 = vector.shape_cast %11 : vector<16xf32> to vector<16x1xf32>
    %13 = vector.broadcast %12 : vector<16x1xf32> to vector<16x16xf32>
    %14 = arith.subf %10, %13 : vector<16x16xf32>
    %15 = math.exp %14 : vector<16x16xf32>
    %cst_8 = arith.constant dense<0.000000e+00> : vector<16xf32>
    %16 = vector.multi_reduction <add>, %15, %cst_8 [1] : vector<16x16xf32> to vector<16xf32>
    %17 = vector.shape_cast %16 : vector<16xf32> to vector<16x1xf32>
    %cst_9 = arith.constant 8.000000e+00 : f32
    %18 = vector.broadcast %cst_9 : f32 to vector<16x1xf32>
    %19 = arith.mulf %17, %18 : vector<16x1xf32>
    %20 = tpu.reciprocal %19 : vector<16x1xf32> -> vector<16x1xf32>
    %21 = vector.broadcast %20 : vector<16x1xf32> to vector<16x16xf32>
    %22 = arith.mulf %15, %21 : vector<16x16xf32>
    %cst_10 = arith.constant dense<0.000000e+00> : vector<16x8xf32>
    %23 = tpu.matmul %22, %9, %cst_10 {dimension_numbers = #tpu.dot_dimension_numbers<[1], [0], [0], [1], [0, 0, 1, 1], [], []>} : vector<16x16xf32>, vector<16x8xf32>, vector<16x8xf32> -> vector<16x8xf32>
    %24 = vector.extract_strided_slice %6 {offsets = [0, 8], sizes = [16, 8], strides = [1, 1]} : vector<16x192xf32> to vector<16x8xf32>
    %25 = vector.extract_strided_slice %6 {offsets = [0, 72], sizes = [16, 8], strides = [1, 1]} : vector<16x192xf32> to vector<16x8xf32>
    %26 = vector.extract_strided_slice %6 {offsets = [0, 136], sizes = [16, 8], strides = [1, 1]} : vector<16x192xf32> to vector<16x8xf32>
    %cst_11 = arith.constant dense<0.000000e+00> : vector<16x16xf32>
    %27 = tpu.matmul %24, %25, %cst_11 {dimension_numbers = #tpu.dot_dimension_numbers<[1], [1], [0], [0], [0, 0, 1, 0], [], []>} : vector<16x8xf32>, vector<16x8xf32>, vector<16x16xf32> -> vector<16x16xf32>
    %cst_12 = arith.constant dense<0xFF800000> : vector<16xf32>
    %28 = vector.multi_reduction <maximumf>, %27, %cst_12 [1] : vector<16x16xf32> to vector<16xf32>
    %29 = vector.shape_cast %28 : vector<16xf32> to vector<16x1xf32>
    %30 = vector.broadcast %29 : vector<16x1xf32> to vector<16x16xf32>
    %31 = arith.subf %27, %30 : vector<16x16xf32>
    %32 = math.exp %31 : vector<16x16xf32>
    %cst_13 = arith.constant dense<0.000000e+00> : vector<16xf32>
    %33 = vector.multi_reduction <add>, %32, %cst_13 [1] : vector<16x16xf32> to vector<16xf32>
    %34 = vector.shape_cast %33 : vector<16xf32> to vector<16x1xf32>
    %cst_14 = arith.constant 8.000000e+00 : f32
    %35 = vector.broadcast %cst_14 : f32 to vector<16x1xf32>
    %36 = arith.mulf %34, %35 : vector<16x1xf32>
    %37 = tpu.reciprocal %36 : vector<16x1xf32> -> vector<16x1xf32>
    %38 = vector.broadcast %37 : vector<16x1xf32> to vector<16x16xf32>
    %39 = arith.mulf %32, %38 : vector<16x16xf32>
    %cst_15 = arith.constant dense<0.000000e+00> : vector<16x8xf32>
    %40 = tpu.matmul %39, %26, %cst_15 {dimension_numbers = #tpu.dot_dimension_numbers<[1], [0], [0], [1], [0, 0, 1, 1], [], []>} : vector<16x16xf32>, vector<16x8xf32>, vector<16x8xf32> -> vector<16x8xf32>
    %41 = vector.extract_strided_slice %6 {offsets = [0, 16], sizes = [16, 8], strides = [1, 1]} : vector<16x192xf32> to vector<16x8xf32>
    %42 = vector.extract_strided_slice %6 {offsets = [0, 80], sizes = [16, 8], strides = [1, 1]} : vector<16x192xf32> to vector<16x8xf32>
    %43 = vector.extract_strided_slice %6 {offsets = [0, 144], sizes = [16, 8], strides = [1, 1]} : vector<16x192xf32> to vector<16x8xf32>
    %cst_16 = arith.constant dense<0.000000e+00> : vector<16x16xf32>
    %44 = tpu.matmul %41, %42, %cst_16 {dimension_numbers = #tpu.dot_dimension_numbers<[1], [1], [0], [0], [0, 0, 1, 0], [], []>} : vector<16x8xf32>, vector<16x8xf32>, vector<16x16xf32> -> vector<16x16xf32>
    %cst_17 = arith.constant dense<0xFF800000> : vector<16xf32>
    %45 = vector.multi_reduction <maximumf>, %44, %cst_17 [1] : vector<16x16xf32> to vector<16xf32>
    %46 = vector.shape_cast %45 : vector<16xf32> to vector<16x1xf32>
    %47 = vector.broadcast %46 : vector<16x1xf32> to vector<16x16xf32>
    %48 = arith.subf %44, %47 : vector<16x16xf32>
    %49 = math.exp %48 : vector<16x16xf32>
    %cst_18 = arith.constant dense<0.000000e+00> : vector<16xf32>
    %50 = vector.multi_reduction <add>, %49, %cst_18 [1] : vector<16x16xf32> to vector<16xf32>
    %51 = vector.shape_cast %50 : vector<16xf32> to vector<16x1xf32>
    %cst_19 = arith.constant 8.000000e+00 : f32
    %52 = vector.broadcast %cst_19 : f32 to vector<16x1xf32>
    %53 = arith.mulf %51, %52 : vector<16x1xf32>
    %54 = tpu.reciprocal %53 : vector<16x1xf32> -> vector<16x1xf32>
    %55 = vector.broadcast %54 : vector<16x1xf32> to vector<16x16xf32>
    %56 = arith.mulf %49, %55 : vector<16x16xf32>
    %cst_20 = arith.constant dense<0.000000e+00> : vector<16x8xf32>
    %57 = tpu.matmul %56, %43, %cst_20 {dimension_numbers = #tpu.dot_dimension_numbers<[1], [0], [0], [1], [0, 0, 1, 1], [], []>} : vector<16x16xf32>, vector<16x8xf32>, vector<16x8xf32> -> vector<16x8xf32>
    %58 = vector.extract_strided_slice %6 {offsets = [0, 24], sizes = [16, 8], strides = [1, 1]} : vector<16x192xf32> to vector<16x8xf32>
    %59 = vector.extract_strided_slice %6 {offsets = [0, 88], sizes = [16, 8], strides = [1, 1]} : vector<16x192xf32> to vector<16x8xf32>
    %60 = vector.extract_strided_slice %6 {offsets = [0, 152], sizes = [16, 8], strides = [1, 1]} : vector<16x192xf32> to vector<16x8xf32>
    %cst_21 = arith.constant dense<0.000000e+00> : vector<16x16xf32>
    %61 = tpu.matmul %58, %59, %cst_21 {dimension_numbers = #tpu.dot_dimension_numbers<[1], [1], [0], [0], [0, 0, 1, 0], [], []>} : vector<16x8xf32>, vector<16x8xf32>, vector<16x16xf32> -> vector<16x16xf32>
    %cst_22 = arith.constant dense<0xFF800000> : vector<16xf32>
    %62 = vector.multi_reduction <maximumf>, %61, %cst_22 [1] : vector<16x16xf32> to vector<16xf32>
    %63 = vector.shape_cast %62 : vector<16xf32> to vector<16x1xf32>
    %64 = vector.broadcast %63 : vector<16x1xf32> to vector<16x16xf32>
    %65 = arith.subf %61, %64 : vector<16x16xf32>
    %66 = math.exp %65 : vector<16x16xf32>
    %cst_23 = arith.constant dense<0.000000e+00> : vector<16xf32>
    %67 = vector.multi_reduction <add>, %66, %cst_23 [1] : vector<16x16xf32> to vector<16xf32>
    %68 = vector.shape_cast %67 : vector<16xf32> to vector<16x1xf32>
    %cst_24 = arith.constant 8.000000e+00 : f32
    %69 = vector.broadcast %cst_24 : f32 to vector<16x1xf32>
    %70 = arith.mulf %68, %69 : vector<16x1xf32>
    %71 = tpu.reciprocal %70 : vector<16x1xf32> -> vector<16x1xf32>
    %72 = vector.broadcast %71 : vector<16x1xf32> to vector<16x16xf32>
    %73 = arith.mulf %66, %72 : vector<16x16xf32>
    %cst_25 = arith.constant dense<0.000000e+00> : vector<16x8xf32>
    %74 = tpu.matmul %73, %60, %cst_25 {dimension_numbers = #tpu.dot_dimension_numbers<[1], [0], [0], [1], [0, 0, 1, 1], [], []>} : vector<16x16xf32>, vector<16x8xf32>, vector<16x8xf32> -> vector<16x8xf32>
    %75 = vector.extract_strided_slice %6 {offsets = [0, 32], sizes = [16, 8], strides = [1, 1]} : vector<16x192xf32> to vector<16x8xf32>
    %76 = vector.extract_strided_slice %6 {offsets = [0, 96], sizes = [16, 8], strides = [1, 1]} : vector<16x192xf32> to vector<16x8xf32>
    %77 = vector.extract_strided_slice %6 {offsets = [0, 160], sizes = [16, 8], strides = [1, 1]} : vector<16x192xf32> to vector<16x8xf32>
    %cst_26 = arith.constant dense<0.000000e+00> : vector<16x16xf32>
    %78 = tpu.matmul %75, %76, %cst_26 {dimension_numbers = #tpu.dot_dimension_numbers<[1], [1], [0], [0], [0, 0, 1, 0], [], []>} : vector<16x8xf32>, vector<16x8xf32>, vector<16x16xf32> -> vector<16x16xf32>
    %cst_27 = arith.constant dense<0xFF800000> : vector<16xf32>
    %79 = vector.multi_reduction <maximumf>, %78, %cst_27 [1] : vector<16x16xf32> to vector<16xf32>
    %80 = vector.shape_cast %79 : vector<16xf32> to vector<16x1xf32>
    %81 = vector.broadcast %80 : vector<16x1xf32> to vector<16x16xf32>
    %82 = arith.subf %78, %81 : vector<16x16xf32>
    %83 = math.exp %82 : vector<16x16xf32>
    %cst_28 = arith.constant dense<0.000000e+00> : vector<16xf32>
    %84 = vector.multi_reduction <add>, %83, %cst_28 [1] : vector<16x16xf32> to vector<16xf32>
    %85 = vector.shape_cast %84 : vector<16xf32> to vector<16x1xf32>
    %cst_29 = arith.constant 8.000000e+00 : f32
    %86 = vector.broadcast %cst_29 : f32 to vector<16x1xf32>
    %87 = arith.mulf %85, %86 : vector<16x1xf32>
    %88 = tpu.reciprocal %87 : vector<16x1xf32> -> vector<16x1xf32>
    %89 = vector.broadcast %88 : vector<16x1xf32> to vector<16x16xf32>
    %90 = arith.mulf %83, %89 : vector<16x16xf32>
    %cst_30 = arith.constant dense<0.000000e+00> : vector<16x8xf32>
    %91 = tpu.matmul %90, %77, %cst_30 {dimension_numbers = #tpu.dot_dimension_numbers<[1], [0], [0], [1], [0, 0, 1, 1], [], []>} : vector<16x16xf32>, vector<16x8xf32>, vector<16x8xf32> -> vector<16x8xf32>
    %92 = vector.extract_strided_slice %6 {offsets = [0, 40], sizes = [16, 8], strides = [1, 1]} : vector<16x192xf32> to vector<16x8xf32>
    %93 = vector.extract_strided_slice %6 {offsets = [0, 104], sizes = [16, 8], strides = [1, 1]} : vector<16x192xf32> to vector<16x8xf32>
    %94 = vector.extract_strided_slice %6 {offsets = [0, 168], sizes = [16, 8], strides = [1, 1]} : vector<16x192xf32> to vector<16x8xf32>
    %cst_31 = arith.constant dense<0.000000e+00> : vector<16x16xf32>
    %95 = tpu.matmul %92, %93, %cst_31 {dimension_numbers = #tpu.dot_dimension_numbers<[1], [1], [0], [0], [0, 0, 1, 0], [], []>} : vector<16x8xf32>, vector<16x8xf32>, vector<16x16xf32> -> vector<16x16xf32>
    %cst_32 = arith.constant dense<0xFF800000> : vector<16xf32>
    %96 = vector.multi_reduction <maximumf>, %95, %cst_32 [1] : vector<16x16xf32> to vector<16xf32>
    %97 = vector.shape_cast %96 : vector<16xf32> to vector<16x1xf32>
    %98 = vector.broadcast %97 : vector<16x1xf32> to vector<16x16xf32>
    %99 = arith.subf %95, %98 : vector<16x16xf32>
    %100 = math.exp %99 : vector<16x16xf32>
    %cst_33 = arith.constant dense<0.000000e+00> : vector<16xf32>
    %101 = vector.multi_reduction <add>, %100, %cst_33 [1] : vector<16x16xf32> to vector<16xf32>
    %102 = vector.shape_cast %101 : vector<16xf32> to vector<16x1xf32>
    %cst_34 = arith.constant 8.000000e+00 : f32
    %103 = vector.broadcast %cst_34 : f32 to vector<16x1xf32>
    %104 = arith.mulf %102, %103 : vector<16x1xf32>
    %105 = tpu.reciprocal %104 : vector<16x1xf32> -> vector<16x1xf32>
    %106 = vector.broadcast %105 : vector<16x1xf32> to vector<16x16xf32>
    %107 = arith.mulf %100, %106 : vector<16x16xf32>
    %cst_35 = arith.constant dense<0.000000e+00> : vector<16x8xf32>
    %108 = tpu.matmul %107, %94, %cst_35 {dimension_numbers = #tpu.dot_dimension_numbers<[1], [0], [0], [1], [0, 0, 1, 1], [], []>} : vector<16x16xf32>, vector<16x8xf32>, vector<16x8xf32> -> vector<16x8xf32>
    %109 = vector.extract_strided_slice %6 {offsets = [0, 48], sizes = [16, 8], strides = [1, 1]} : vector<16x192xf32> to vector<16x8xf32>
    %110 = vector.extract_strided_slice %6 {offsets = [0, 112], sizes = [16, 8], strides = [1, 1]} : vector<16x192xf32> to vector<16x8xf32>
    %111 = vector.extract_strided_slice %6 {offsets = [0, 176], sizes = [16, 8], strides = [1, 1]} : vector<16x192xf32> to vector<16x8xf32>
    %cst_36 = arith.constant dense<0.000000e+00> : vector<16x16xf32>
    %112 = tpu.matmul %109, %110, %cst_36 {dimension_numbers = #tpu.dot_dimension_numbers<[1], [1], [0], [0], [0, 0, 1, 0], [], []>} : vector<16x8xf32>, vector<16x8xf32>, vector<16x16xf32> -> vector<16x16xf32>
    %cst_37 = arith.constant dense<0xFF800000> : vector<16xf32>
    %113 = vector.multi_reduction <maximumf>, %112, %cst_37 [1] : vector<16x16xf32> to vector<16xf32>
    %114 = vector.shape_cast %113 : vector<16xf32> to vector<16x1xf32>
    %115 = vector.broadcast %114 : vector<16x1xf32> to vector<16x16xf32>
    %116 = arith.subf %112, %115 : vector<16x16xf32>
    %117 = math.exp %116 : vector<16x16xf32>
    %cst_38 = arith.constant dense<0.000000e+00> : vector<16xf32>
    %118 = vector.multi_reduction <add>, %117, %cst_38 [1] : vector<16x16xf32> to vector<16xf32>
    %119 = vector.shape_cast %118 : vector<16xf32> to vector<16x1xf32>
    %cst_39 = arith.constant 8.000000e+00 : f32
    %120 = vector.broadcast %cst_39 : f32 to vector<16x1xf32>
    %121 = arith.mulf %119, %120 : vector<16x1xf32>
    %122 = tpu.reciprocal %121 : vector<16x1xf32> -> vector<16x1xf32>
    %123 = vector.broadcast %122 : vector<16x1xf32> to vector<16x16xf32>
    %124 = arith.mulf %117, %123 : vector<16x16xf32>
    %cst_40 = arith.constant dense<0.000000e+00> : vector<16x8xf32>
    %125 = tpu.matmul %124, %111, %cst_40 {dimension_numbers = #tpu.dot_dimension_numbers<[1], [0], [0], [1], [0, 0, 1, 1], [], []>} : vector<16x16xf32>, vector<16x8xf32>, vector<16x8xf32> -> vector<16x8xf32>
    %126 = vector.extract_strided_slice %6 {offsets = [0, 56], sizes = [16, 8], strides = [1, 1]} : vector<16x192xf32> to vector<16x8xf32>
    %127 = vector.extract_strided_slice %6 {offsets = [0, 120], sizes = [16, 8], strides = [1, 1]} : vector<16x192xf32> to vector<16x8xf32>
    %128 = vector.extract_strided_slice %6 {offsets = [0, 184], sizes = [16, 8], strides = [1, 1]} : vector<16x192xf32> to vector<16x8xf32>
    %cst_41 = arith.constant dense<0.000000e+00> : vector<16x16xf32>
    %129 = tpu.matmul %126, %127, %cst_41 {dimension_numbers = #tpu.dot_dimension_numbers<[1], [1], [0], [0], [0, 0, 1, 0], [], []>} : vector<16x8xf32>, vector<16x8xf32>, vector<16x16xf32> -> vector<16x16xf32>
    %cst_42 = arith.constant dense<0xFF800000> : vector<16xf32>
    %130 = vector.multi_reduction <maximumf>, %129, %cst_42 [1] : vector<16x16xf32> to vector<16xf32>
    %131 = vector.shape_cast %130 : vector<16xf32> to vector<16x1xf32>
    %132 = vector.broadcast %131 : vector<16x1xf32> to vector<16x16xf32>
    %133 = arith.subf %129, %132 : vector<16x16xf32>
    %134 = math.exp %133 : vector<16x16xf32>
    %cst_43 = arith.constant dense<0.000000e+00> : vector<16xf32>
    %135 = vector.multi_reduction <add>, %134, %cst_43 [1] : vector<16x16xf32> to vector<16xf32>
    %136 = vector.shape_cast %135 : vector<16xf32> to vector<16x1xf32>
    %cst_44 = arith.constant 8.000000e+00 : f32
    %137 = vector.broadcast %cst_44 : f32 to vector<16x1xf32>
    %138 = arith.mulf %136, %137 : vector<16x1xf32>
    %139 = tpu.reciprocal %138 : vector<16x1xf32> -> vector<16x1xf32>
    %140 = vector.broadcast %139 : vector<16x1xf32> to vector<16x16xf32>
    %141 = arith.mulf %134, %140 : vector<16x16xf32>
    %cst_45 = arith.constant dense<0.000000e+00> : vector<16x8xf32>
    %142 = tpu.matmul %141, %128, %cst_45 {dimension_numbers = #tpu.dot_dimension_numbers<[1], [0], [0], [1], [0, 0, 1, 1], [], []>} : vector<16x16xf32>, vector<16x8xf32>, vector<16x8xf32> -> vector<16x8xf32>
    %143 = tpu.concatenate %23, %40, %57, %74, %91, %108, %125, %142 in 1 : vector<16x8xf32>, vector<16x8xf32>, vector<16x8xf32>, vector<16x8xf32>, vector<16x8xf32>, vector<16x8xf32>, vector<16x8xf32>, vector<16x8xf32> -> vector<16x64xf32>
    %c0_46 = arith.constant 0 : index
    %c0_47 = arith.constant 0 : index
    %144 = vector.load %arg4[%c0_46, %c0_47] : memref<64x64xf32, #tpu.memory_space<vmem>>, vector<64x64xf32>
    %cst_48 = arith.constant dense<0.000000e+00> : vector<16x64xf32>
    %145 = tpu.matmul %143, %144, %cst_48 {dimension_numbers = #tpu.dot_dimension_numbers<[1], [0], [0], [1], [0, 0, 1, 1], [], []>} : vector<16x64xf32>, vector<64x64xf32>, vector<16x64xf32> -> vector<16x64xf32>
    %c0_49 = arith.constant 0 : index
    %c0_50 = arith.constant 0 : index
    %146 = vector.load %arg5[%c0_49, %c0_50] : memref<1x64xf32, #tpu.memory_space<vmem>>, vector<1x64xf32>
    %147 = vector.broadcast %146 : vector<1x64xf32> to vector<16x64xf32>
    %148 = arith.addf %145, %147 : vector<16x64xf32>
    %149 = vector.shape_cast %148 : vector<16x64xf32> to vector<1x16x64xf32>
    %c0_51 = arith.constant 0 : index
    %c0_52 = arith.constant 0 : index
    %c0_53 = arith.constant 0 : index
    %150 = vector.load %arg6[%c0_51, %c0_52, %c0_53] : memref<1x16x64xf32, #tpu.memory_space<vmem>>, vector<1x16x64xf32>
    tpu.vector_store %arg6[%c0_51, %c0_52, %c0_53], %149 {strides = array<i32>} : memref<1x16x64xf32, #tpu.memory_space<vmem>>, vector<1x16x64xf32>,
    return
  }
  func.func @transform_0(%arg0: i32) -> (i32, i32, i32) {
    %c0_i32 = arith.constant 0 : i32
    %c0_i32_0 = arith.constant 0 : i32
    %c0_i32_1 = arith.constant 0 : i32
    return %arg0, %c0_i32, %c0_i32_0 : i32, i32, i32
  }
  func.func @transform_1(%arg0: i32) -> (i32, i32) {
    %c0_i32 = arith.constant 0 : i32
    %c0_i32_0 = arith.constant 0 : i32
    %c0_i32_1 = arith.constant 0 : i32
    return %c0_i32, %c0_i32_0 : i32, i32
  }
  func.func @transform_2(%arg0: i32) -> (i32, i32) {
    %c0_i32 = arith.constant 0 : i32
    %c0_i32_0 = arith.constant 0 : i32
    %c0_i32_1 = arith.constant 0 : i32
    return %c0_i32, %c0_i32_0 : i32, i32
  }
  func.func @transform_3(%arg0: i32) -> (i32, i32) {
    %c0_i32 = arith.constant 0 : i32
    %c0_i32_0 = arith.constant 0 : i32
    %c0_i32_1 = arith.constant 0 : i32
    return %c0_i32, %c0_i32_0 : i32, i32
  }
  func.func @transform_4(%arg0: i32) -> (i32, i32) {
    %c0_i32 = arith.constant 0 : i32
    %c0_i32_0 = arith.constant 0 : i32
    %c0_i32_1 = arith.constant 0 : i32
    return %c0_i32, %c0_i32_0 : i32, i32
  }
  func.func @transform_5(%arg0: i32) -> (i32, i32, i32) {
    %c0_i32 = arith.constant 0 : i32
    %c0_i32_0 = arith.constant 0 : i32
    %c0_i32_1 = arith.constant 0 : i32
    return %arg0, %c0_i32, %c0_i32_0 : i32, i32, i32
  }
}

</mosaic_0001>

<bundles_post_ra>
// kernel: tpu_custom_call.1
= control target key start
LH: loop header
LB: loop body
LE: loop exit
PB: predicated region body
PF: predicated region fallthrough
CT: control target
= control target key end

     0   :  { %10 = vsyncpa [#allocation3], 0  ;;  %s2630_s0 = inlined_call_operand.hbm [shape: f32[2,16,64], index: 0, kind: input, shape index: {}]   ;;  %s2631_s1 = inlined_call_operand.hbm [shape: f32[64,192], index: 1, kind: input, shape index: {}]   ;;  %s2632_s2 = inlined_call_operand.hbm [shape: f32[1,192], index: 2, kind: input, shape index: {}]   ;;  %s2633_s3 = inlined_call_operand.hbm [shape: f32[64,64], index: 3, kind: input, shape index: {}]   ;;  %s2634_s4 = inlined_call_operand.vmem [shape: f32[1,64], index: 4, kind: input, shape index: {}]   ;;  %s2635_s5 = inlined_call_operand.hbm [shape: f32[2,16,64], index: 5, kind: output, shape index: {}]  }
   0x1   :  { %12 = vsyncpa [#allocation3 + $0x1], 0 }
   0x2   :  { %13 = vsyncpa [#allocation6], 0 }
   0x3   :  { %14 = vsyncpa [#allocation9], 0 }
   0x4   :  { %15 = vsyncpa [#allocation4], 0 }
   0x5   :  { %17 = vsyncpa [#allocation4 + $0x1], 0  ;;  %s2118_s18 = smov 0   ;;  %s2120_s19 = smov 0  }
   0x6   :  { %s2122_s20 = smov 0   ;;  %s2124_s21 = smov 0  }
   0x7 LB: > { %s2139_s22 = sadd.s32 4294967295, %s2063_s21   ;;  %s1594_s23 = sadd.s32 4294967294, %s2063_s21   ;;  %s2063_s21 = sphi %s2124_s21, %s2650_s21   ;;  %s2059_s20 = sphi %s2122_s20, %s2649_s20   ;;  %s2055_s19 = sphi %s2120_s19, %s2648_s19   ;;  %s2051_s18 = sphi %s2118_s18, %s2647_s18  }
   0x8   : > { %p43_p0 = scmp.ne.s32.totalorder %s2055_s19, %s2051_s18  ;;  %p44_p1 = scmp.eq.s32.totalorder %s2139_s22, 0 }
   0x9   : > { %p151_p2 = scmp.eq.s32.totalorder %s2139_s22, 1  ;;  %p157_p3 = scmp.eq.s32.totalorder %s1594_s23, 1 }
   0xa   : > { %p2148_p4 = por %p44_p1, %p43_p0  ;;  %p1595_p5 = scmp.ge.s32.totalorder %s2063_s21, 1 }
   0xb   : > { %p2153_p6 = por %p157_p3, %p43_p0  ;;  %p164_p7 = scmp.lt.s32.totalorder %s2063_s21, 3 }
   0xc   : > { %s175_s28 = sshll.u32 %s2631_s1, 4  ;;  %s2065_s30 = smov [#allocation5]   ;;  %s176_s28 = int_to_ptr.hbm [resolvable:$true] %s175_s28 }
   0xd   : > { %p2161_p8 = pnand %p1595_p5, %p164_p7  ;;  %s177_s6 = sshll.u32 %s2065_s30, 4  ;;  %s178_s6 = int_to_ptr.vmem [resolvable:$true] %s177_s6 }
   0xe   : > { %s190_s10 = sshll.u32 %s2632_s2, 4  ;;  %s2066_s11 = smov 256   ;;  %s191_s10 = int_to_ptr.hbm [resolvable:$true] %s190_s10 }
   0xf   : > { %p1688_p9 = pneg %p2161_p8  ;;  %s2067_s12 = smov 16  }
  0x10   : > { %s2068_s13 = smov [#allocation7]   ;;  %s201_s17 = sshll.u32 %s2633_s3, 4  ;;  %s202_s17 = int_to_ptr.hbm [resolvable:$true] %s201_s17 }
  0x11   : > { %p2169_p10 = pnand %p1688_p9, %p44_p1  ;;  %s192_s14 = sshll.u32 %s2068_s13, 4  ;;  %s193_s14 = int_to_ptr.vmem [resolvable:$true] %s192_s14 }
  0x12   : > { %s2069_s23 = smov [#allocation8]   ;;  %s2636_s27 = smov 128  }
  0x13   : > { %1691 = dma.hbm_to_vmem [thread:$0]  (!%p2169_p10), %s176_s28, 2048, %s178_s6, [#allocation6], %s2066_s11, %s2066_s11, %s2067_s12  }
  0x14   : > { %1694 = dma.hbm_to_vmem [thread:$0]  (!%p2169_p10), %s191_s10, 32, %s193_s14, [#allocation6]  }
  0x15   : > { %s203_s26 = sshll.u32 %s2069_s23, 4  ;;  %s2071_s28 = smov 8   ;;  %s204_s26 = int_to_ptr.vmem [resolvable:$true] %s203_s26 }
  0x16   : > { %1697 = dma.hbm_to_vmem [thread:$0]  (!%p2169_p10), %s202_s17, 1024, %s204_s26, [#allocation9], %s2636_s27, %s2636_s27, %s2071_s28  }
  0x17   : > { %s2190_s30 = sadd.s32 1, %s2063_s21   ;;  %s30_s8 = sadd.s32 1, %s2059_s20 }
  0x18   : > { %s27_s6 = ssub.s32 %s2063_s21, %s2190_s30  ;;  %p37_p13 = scmp.ne.s32.totalorder %s2059_s20, %s2055_s19 }
  0x19   : > { %p28_p12 = scmp.eq.s32.totalorder %s27_s6, 0  ;;  %p38_p0 = scmp.eq.s32.totalorder %s2063_s21, 0 }
  0x1a   : > { %p2203_p3 = por %p151_p2, %p37_p13  ;;  %p1709_p5 = scmp.lt.s32.totalorder %s2063_s21, 2 }
  0x1b   : > { %s2199_s9 = scalar_select %p28_p12, %s2059_s20, %s30_s8  }
  0x1c   : > { %s220_s7 = sand.u32 1, %s2059_s20   ;;  %s1668_s11 = sshll.u32 %s2063_s21, 4 }
  0x1d   : > { %p39_p7 = por %p38_p0, %p37_p13  ;;  %s1600_s12 = sshll.u32 %s220_s7, 4 }
  0x1e   : > { %s229_s15 = scalar_lea.hbm %s2630_s0, %s1668_s11  ;;  %s224_s17 = scalar_lea.vmem [#allocation2], %s1600_s12 }
  0x1f   : > { %s230_s16 = sshll.u32 %s229_s15, 4  ;;  %s232_s23 = sshll.u32 %s224_s17, 4  ;;  %s231_s16 = int_to_ptr.hbm [resolvable:$true] %s230_s16  ;;  %s233_s23 = int_to_ptr.vmem [resolvable:$true] %s232_s23 }
  0x20   : > { %p2213_p9 = pnand %p1709_p5, %p39_p7  ;;  %s221_s6 = scalar_lea.sflag [#allocation3], %s220_s7 }
  0x21   : > { %s1959_s8 = sshra.s32 %s231_s16, 4  ;;  %s1966_s12 = scalar_lea.hbm %s2630_s0, 32  ;;  %s1960_s8 = int_to_ptr.hbm [resolvable:$true] %s1959_s8 }
  0x22   : > { %s1961_s27 = scalar_lea.hbm %s1960_s8, 16  ;;  %p1963_p10 = pneg %p2213_p9 }
  0x23   : > { %p1962_p2 = scmp.ne.s32.totalorder %s1960_s8, %s1961_s27  ;;  %p1967_p0 = scmp.lt.s32.totalorder %s1960_s8, %s2630_s0 }
  0x24   : > { %p1968_p5 = scmp.lt.s32.totalorder %s1966_s12, %s1961_s27 }
  0x25   : > { %p1964_p12 = pnand %p1963_p10, %p1962_p2 }
  0x26   : > { %p1969_p7 = por %p1968_p5, %p1967_p0 }
  0x27   : > { %p1965_p13 = pneg %p1964_p12 }
  0x29   : > { %p1970_p11 = pnand %p1969_p7, %p1965_p13 }
  0x2b   : > { %1973 = shalt.err (!%p1970_p11)
}
  0x2c   : > { %s2643_s7 = smov 128   ;;  %244 = sbr.rel (%p2161_p8) target bundleno = 1682 (0x692), region = 40 }
  0x2d   : > { %1701 = dma.hbm_to_vmem [thread:$0]  (!%p2213_p9), %s231_s16, 256, %s233_s23, %s221_s6, %s2643_s7, %s2643_s7, %s2071_s28  }
  0x2e   : > { %s2233_s17 = sand.u32 (!%p2161_p8), 1, %s2055_s19  }
  0x2f   : > { %s1604_s27 = sshll.u32 (!%p2161_p8), %s2233_s17, 4  ;;  %s247_s8 = scalar_lea.sflag (!%p2161_p8), [#allocation3], %s2233_s17 }
  0x30   : > { %s2239_s11 = scalar_lea.vmem (!%p2161_p8), [#allocation2], %s1604_s27 }
  0x31   : > { %2034 = dma.done.wait (%p2148_p4), %s247_s8, 256  }
  0x32   : > { %2036 = vsyncadd (%p2148_p4), %s247_s8, 4294967040 }
  0x33   : > { %2038 = dma.done.wait (%p44_p1), [#allocation6], 2080  }
  0x34   : > { %2040 = vsyncadd (%p44_p1), [#allocation6], 4294965216 }
  0x35   : > { %2042 = dma.done.wait (%p44_p1), [#allocation9], 1024  }
  0x36   : > { %2044 = vsyncadd (%p44_p1), [#allocation9], 4294966272  ;;  %v309_v0 = vld [vmem:[#allocation5 + $0x70] sm:$0xff]  ;;  %v307_v1 = vld [vmem:[#allocation5 + $0x60] sm:$0xff]  ;;  %vm317_vm0 = vcmask 523264   ;;  %s2072_s24 = smov 120  }
  0x37   : > { %332 = vmatpush.msra.mxu0 %v309_v0  ;;  %v305_v2 = vld [vmem:[#allocation5 + $0x50] sm:$0xff]  ;;  %v310_v3 = vld [vmem:[#allocation5 + $0x78] sm:$0xff]  ;;  %v308_v4 = vld [vmem:[#allocation5 + $0x68] sm:$0xff]  ;;  %s2073_s29 = smov 64   ;;  %s2074_s28 = smov 104   ;;  %vm376_vm1 = vcmask 64512  }
  0x38   : > { %v303_v5 = vld [vmem:[#allocation5 + $0x40] sm:$0xff]  ;;  %355 = vmatpush.msra.mxu1 %v310_v3  ;;  %v306_v6 = vld [vmem:[#allocation5 + $0x58] sm:$0xff]  ;;  %v301_v7 = vld [vmem:[#allocation5 + $0x30] sm:$0xff]  ;;  %s2075_s16 = smov 56   ;;  %s2076_s23 = smov 40   ;;  %vm408_vm2 = vcmask 130048  }
  0x39   : > { %333 = vmatpush.msra.mxu0 %v307_v1  ;;  %v304_v8 = vld [vmem:[#allocation5 + $0x48] sm:$0xff]  ;;  %v299_v9 = vld [vmem:[#allocation5 + $0x20] sm:$0xff]  ;;  %v302_v10 = vld [vmem:[#allocation5 + $0x38] sm:$0xff]  ;;  %s2077_s26 = smov 48   ;;  %s2078_s6 = smov 112  }
  0x3a   : > { %356 = vmatpush.msra.mxu1 %v308_v4  ;;  %v297_v11 = vld [vmem:[#allocation5 + $0x10] sm:$0xff]  ;;  %v300_v12 = vld [vmem:[#allocation5 + $0x28] sm:$0xff]  ;;  %v295_v13 = vld [vmem:[#allocation5] sm:$0xff]  ;;  %s2079_s13 = smov 88   ;;  %s2080_s12 = smov 8  }
  0x3b   : > { %334 = vmatpush.msra.mxu0 %v305_v2  ;;  %v293_v14 = vld [vmem:[%s2239_s11] sm:$0xff]  ;;  %v294_v15 = vld [vmem:[%s2239_s11 + $0x8] sm:$0xff]  ;;  %s2081_s14 = smov 16   ;;  %s2082_s15 = smov 80  }
  0x3c   : > { %357 = vmatpush.msra.mxu1 %v306_v6  ;;  %v298_v16 = vld [vmem:[#allocation5 + $0x18] sm:$0xff]  ;;  %v296_v17 = vld [vmem:[#allocation5 + $0x8] sm:$0xff]  ;;  %v311_v18 = vld [vmem:[#allocation7] sm:$0x3]  ;;  %s2083_s7 = smov 24   ;;  %s2084_s8 = smov 32  }
  0x3d   : > { %335 = vmatpush.msra.mxu0 %v303_v5  ;;  %v313_v19 = vperm.slane %v311_v18, 0  ;;  %v314_v25 = vperm.slane %v311_v18, 1  ;;  %s2085_s11 = smov 96  }
  0x3e   : > { %358 = vmatpush.msra.mxu1 %v304_v8 }
  0x3f   : > { %336 = vmatpush.msra.mxu0 %v301_v7 }
  0x40   : > { %359 = vmatpush.msra.mxu1 %v302_v10 }
  0x41   : > { %337 = vmatpush.msra.mxu0 %v299_v9 }
  0x42   : > { %360 = vmatpush.msra.mxu1 %v300_v12 }
  0x43   : > { %338 = vmatpush.msra.mxu0 %v297_v11 }
  0x44   : > { %361 = vmatpush.msra.mxu1 %v298_v16 }
  0x45   : > { %339 = vmatpush.msra.mxu0 %v295_v13 }
  0x46   : > { %1609 = vmatmul.msk.f32.vlgmr.msra.gmra.mxu0 %vm317_vm0, %v293_v14  ;;  %362 = vmatpush.msra.mxu1 %v296_v17 }
  0x47   : > { %1611 = vmatmul.msk.f32.vlgmr.msra.gmra.mxu1 %vm317_vm0, %v293_v14 }
  0x4e   : > { %1610 = vmatmul.msk.f32.gmra.mxu0 %vm317_vm0, %v294_v15 }
  0x4f   : > { %1612 = vmatmul.msk.f32.gmra.mxu1 %vm317_vm0, %v294_v15 }
  0xc3   : > { %v341_v20 = vpop.f32.mrf.mxu0 }
  0xc4   : > { %v2259_v21 = vadd.f32 %v341_v20, %v313_v19  ;;  %v364_v24 = vpop.f32.mrf.mxu1 }
  0xc5   : > { %v2289_v27 = vadd.f32 %v364_v24, %v314_v25 }
  0xc6   : > { %488 = vrot.lane.b32.xlu2 %v2259_v21, %s2072_s24 }
  0xcb   : > { %v344_v22 = vpop.f32.mrf.mxu0 }
  0xcc   : > { %v2263_v23 = vadd.f32 %v344_v22, %v313_v19  ;;  %v367_v26 = vpop.f32.mrf.mxu1 }
  0xcd   : > { %v2291_v28 = vadd.f32 %v367_v26, %v314_v25 }
  0xce   : > { %374 = vrot.lane.b32.xlu0 %v2263_v23, %s2073_s29  ;;  %738 = vrot.lane.b32.xlu2 %v2259_v21, %s2074_s28 }
  0xcf   : > { %479 = vmatpush.msra.mxu3 %v2291_v28 }
  0xd1   : > { %480 = vmatpush.msra.mxu3 %v2289_v27 }
  0xd6   : > { %372 = vrot.lane.b32.xlu0 %v2259_v21, %s2073_s29  ;;  %s2086_s29 = smov 72  }
  0xde   : > { %494 = vrot.lane.b32.xlu0 %v2263_v23, %s2075_s16 }
  0xe6   : > { %490 = vrot.lane.b32.xlu0 %v2263_v23, %s2072_s24 }
  0xee   : > { %744 = vrot.lane.b32.xlu0 %v2263_v23, %s2076_s23 }
  0xf6   : > { %742 = vrot.lane.b32.xlu0 %v2259_v21, %s2076_s23 }
  0xfe   : > { %618 = vrot.lane.b32.xlu0 %v2259_v21, %s2077_s26 }
 0x106   : > { %614 = vrot.lane.b32.xlu0 %v2259_v21, %s2078_s6 }
 0x10e   : > { %616 = vrot.lane.b32.xlu0 %v2263_v23, %s2078_s6 }
 0x116   : > { %988 = vrot.lane.b32.xlu0 %v2263_v23, %s2079_s13 }
 0x11e   : > { %1238 = vrot.lane.b32.xlu0 %v2259_v21, %s2080_s12 }
 0x120   : > { %v489_v54 = vpop.permute.xlu2 %488 }
 0x126   : > { %1116 = vrot.lane.b32.xlu0 %v2263_v23, %s2081_s14 }
 0x128   : > { %v2354_v55 = vpop.permute.xlu2 %738 }
 0x12e   : > { %1110 = vrot.lane.b32.xlu0 %v2259_v21, %s2082_s15 }
 0x140   : > { %v375_v29 = vpop.permute.xlu0 %374 }
 0x141   : > { %1613 = vmatpush.xpose.msk.msra.mxu2 %vm376_vm1, %v375_v29 }
 0x148   : > { %v373_v30 = vpop.permute.xlu0 %372 }
 0x149   : > { %1614 = vmatpush.xpose.msk.msra.mxu2 %vm376_vm1, %v373_v30 }
 0x14c   : > { %1615 = vmatmul.msk.f32.vlgmr.msra.gmra.mxu2 %vm376_vm1, %v2259_v21 }
 0x150   : > { %v495_v31 = vpop.permute.xlu0 %494 }
 0x151   : > { %1619 = vmatpush.xpose.msk.msrb.mxu3 %vm376_vm1, %v495_v31 }
 0x154   : > { %1616 = vmatmul.msk.f32.gmra.mxu2 %vm376_vm1, %v2263_v23 }
 0x158   : > { %v2322_v36 = vpop.permute.xlu0 %490 }
 0x160   : > { %v2324_v40 = vpop.permute.xlu0 %744 }
 0x168   : > { %v2327_v46 = vpop.permute.xlu0 %742 }
 0x170   : > { %v619_v49 = vpop.permute.xlu0 %618 }
 0x178   : > { %v615_v51 = vpop.permute.xlu0 %614 }
 0x180   : > { %v617_v53 = vpop.permute.xlu0 %616 }
 0x188   : > { %v2356_v6 = vpop.permute.xlu0 %988 }
 0x1cf   : > { %v402_v32 = vpop.f32.mrf.mxu2 }
 0x1d0   : > { %v409_v33 = vsel %vm408_vm2, %v402_v32, -inf }
 0x1d1   : > { %410 = vmax.xlane.f32.xlu1 %v409_v33 }
 0x1d7   : > { %v405_v34 = vpop.f32.mrf.mxu2 }
 0x1d8   : > { %v412_v35 = vsel %vm408_vm2, %v405_v34, -inf }
 0x1d9   : > { %413 = vmax.xlane.f32.xlu1 %v412_v35 }
 0x1f2   : > { %492 = vrot.lane.b32.xlu1 %v2259_v21, %s2075_s16 }
 0x1fa   : > { %620 = vrot.lane.b32.xlu1 %v2263_v23, %s2077_s26 }
 0x202   : > { %992 = vrot.lane.b32.xlu1 %v2263_v23, %s2083_s7 }
 0x20a   : > { %986 = vrot.lane.b32.xlu1 %v2259_v21, %s2079_s13 }
 0x212   : > { %866 = vrot.lane.b32.xlu1 %v2259_v21, %s2084_s8 }
 0x21a   : > { %862 = vrot.lane.b32.xlu1 %v2259_v21, %s2085_s11 }
 0x222   : > { %864 = vrot.lane.b32.xlu1 %v2263_v23, %s2085_s11 }
 0x22a   : > { %1236 = vrot.lane.b32.xlu1 %v2263_v23, %s2086_s29 }
 0x244   : > { %v411_v37 = vpop.xlane.xlu1 %410 }
 0x245   : > { %v415_v38 = vsub.f32 %v402_v32, %v411_v37 }
 0x247   : > { %v417_v39 = vmul.f32 1.442695, %v415_v38 }
 0x249   : > { %1805 = vpow2.f32 %v417_v39 }
 0x24c   : > { %v414_v41 = vpop.xlane.xlu1 %413 }
 0x24d   : > { %v416_v42 = vsub.f32 %v405_v34, %v414_v41 }
 0x24f   : > { %v1806_v43 = vpop.eup %1805  ;;  %v419_v44 = vmul.f32 1.442695, %v416_v42 }
 0x250   : > { %v421_v45 = vsel %vm408_vm2, %v1806_v43, 0.0 }
 0x251   : > { %1807 = vpow2.f32 %v419_v44  ;;  %422 = vadd.xlane.f32.xlu2 %v421_v45 }
 0x257   : > { %v2329_v47 = vpop.eup %1807 }
 0x258   : > { %v424_v48 = vsel %vm408_vm2, %v2329_v47, 0.0 }
 0x259   : > { %425 = vadd.xlane.f32.xlu2 %v424_v48 }
 0x264   : > { %v493_v50 = vpop.permute.xlu1 %492 }
 0x265   : > { %1620 = vmatpush.xpose.msk.msrb.mxu3 %vm376_vm1, %v493_v50 }
 0x26c   : > { %v621_v52 = vpop.permute.xlu1 %620 }
 0x26d   : > { %1625 = vmatpush.xpose.msk.msrb.mxu0 %vm376_vm1, %v621_v52  ;;  %1670 = vmatpush.xpose.msk.msrb.mxu1 %vm376_vm1, %v621_v52 }
 0x271   : > { %740 = vrot.lane.b32.xlu2 %v2263_v23, %s2074_s28  ;;  %1626 = vmatpush.xpose.msk.msrb.mxu0 %vm376_vm1, %v619_v49 }
 0x272   : > { %1671 = vmatpush.xpose.msk.msrb.mxu1 %vm376_vm1, %v619_v49 }
 0x274   : > { %1627 = vmatmul.msk.f32.vlgmr.msrb.gmra.mxu0 %vm376_vm1, %v615_v51  ;;  %v993_v58 = vpop.permute.xlu1 %992 }
 0x275   : > { %1628 = vmatmul.msk.f32.vlgmr.msrb.gmra.mxu1 %vm376_vm1, %v617_v53 }
 0x279   : > { %990 = vrot.lane.b32.xlu2 %v2259_v21, %s2083_s7 }
 0x27c   : > { %v987_v7 = vpop.permute.xlu1 %986 }
 0x281   : > { %868 = vrot.lane.b32.xlu2 %v2263_v23, %s2084_s8 }
 0x284   : > { %v867_v22 = vpop.permute.xlu1 %866 }
 0x289   : > { %1240 = vrot.lane.b32.xlu2 %v2263_v23, %s2080_s12 }
 0x28c   : > { %v863_v29 = vpop.permute.xlu1 %862 }
 0x291   : > { %1234 = vrot.lane.b32.xlu2 %v2259_v21, %s2086_s29 }
 0x294   : > { %v865_v34 = vpop.permute.xlu1 %864 }
 0x299   : > { %1114 = vrot.lane.b32.xlu2 %v2259_v21, %s2081_s14  ;;  %v1239_v21 = vpop.permute.xlu0 %1238 }
 0x29c   : > { %v1237_v41 = vpop.permute.xlu1 %1236 }
 0x2a1   : > { %1112 = vrot.lane.b32.xlu2 %v2263_v23, %s2082_s15  ;;  %v1117_v26 = vpop.permute.xlu0 %1116 }
 0x2a9   : > { %v1111_v39 = vpop.permute.xlu0 %1110 }
 0x2c4   : > { %v423_v56 = vpop.xlane.xlu2 %422 }
 0x2c5   : > { %v427_v57 = vmul.f32 8.0, %v423_v56 }
 0x2c7   : > { %1809 = vrcp.f32 %v427_v57  ;;  %v440_v0 = vand.u32 2147483648, %v427_v57  ;;  %v438_v2 = vand.u32 2147483647, %v427_v57  ;;  %vm434_vm4 = vweird.f32 %v427_v57 }
 0x2c9   : > { %v441_v8 = vor.u32 1.1754944e-38, %v440_v0  ;;  %vm439_vm6 = vcmp.eq.f32.partialorder %v438_v2, 8.507059e+37 }
 0x2cc   : > { %v426_v59 = vpop.xlane.xlu2 %425 }
 0x2cd   : > { %v1810_v60 = vpop.eup %1809  ;;  %v428_v61 = vmul.f32 8.0, %v426_v59 }
 0x2ce   : > { %v430_v62 = vmul.f32 %v1810_v60, %v427_v57  ;;  %vm435_vm3 = vweird.f32 %v1810_v60 }
 0x2cf   : > { %1811 = vrcp.f32 %v428_v61  ;;  %vm436_vm5 = vmor %vm434_vm4, %vm435_vm3  ;;  %v454_v14 = vand.u32 2147483648, %v428_v61  ;;  %v452_v16 = vand.u32 2147483647, %v428_v61  ;;  %vm448_vm8 = vweird.f32 %v428_v61 }
 0x2d0   : > { %v431_v63 = vsub.f32 1.0, %v430_v62 }
 0x2d1   : > { %v455_v19 = vor.u32 1.1754944e-38, %v454_v14  ;;  %vm453_vm10 = vcmp.eq.f32.partialorder %v452_v16, 8.507059e+37 }
 0x2d2   : > { %v432_v1 = vmul.f32 %v1810_v60, %v431_v63 }
 0x2d4   : > { %v741_v3 = vpop.permute.xlu2 %740  ;;  %v433_v4 = vadd.f32 %v1810_v60, %v432_v1 }
 0x2d5   : > { %v1812_v5 = vpop.eup %1811 }
 0x2d6   : > { %v444_v9 = vmul.f32 %v1812_v5, %v428_v61  ;;  %v437_v10 = vsel %vm436_vm5, %v1810_v60, %v433_v4  ;;  %vm449_vm7 = vweird.f32 %v1812_v5 }
 0x2d7   : > { %v442_v11 = vsel %vm439_vm6, %v441_v8, %v437_v10  ;;  %vm450_vm9 = vmor %vm448_vm8, %vm449_vm7 }
 0x2d8   : > { %v445_v12 = vsub.f32 1.0, %v444_v9  ;;  %v457_v13 = vmul.f32 %v1806_v43, %v442_v11 }
 0x2da   : > { %1617 = vmatmul.msk.f32.vlgmr.msra.gmra.mxu3 %vm408_vm2, %v457_v13  ;;  %v446_v15 = vmul.f32 %v1812_v5, %v445_v12 }
 0x2db   : > { %1631 = vmatpush.xpose.msk.msra.mxu3 %vm376_vm1, %v2324_v40 }
 0x2dc   : > { %v991_v17 = vpop.permute.xlu2 %990  ;;  %v447_v18 = vadd.f32 %v1812_v5, %v446_v15 }
 0x2de   : > { %v451_v20 = vsel %vm450_vm9, %v1812_v5, %v447_v18 }
 0x2df   : > { %1632 = vmatpush.xpose.msk.msra.mxu3 %vm376_vm1, %v2327_v46  ;;  %v456_v23 = vsel %vm453_vm10, %v455_v19, %v451_v20 }
 0x2e0   : > { %v458_v24 = vmul.f32 %v2329_v47, %v456_v23 }
 0x2e2   : > { %1618 = vmatmul.msk.f32.gmra.mxu3 %vm408_vm2, %v458_v24 }
 0x2e4   : > { %v869_v25 = vpop.permute.xlu2 %868 }
 0x2e5   : > { %1637 = vmatpush.xpose.msk.msra.mxu0 %vm376_vm1, %v869_v25 }
 0x2e9   : > { %1638 = vmatpush.xpose.msk.msra.mxu0 %vm376_vm1, %v867_v22 }
 0x2ea   : > { %1621 = vmatmul.msk.f32.vlgmr.msrb.gmra.mxu3 %vm376_vm1, %v489_v54 }
 0x2eb   : > { %1643 = vmatpush.xpose.msk.msrb.mxu3 %vm376_vm1, %v993_v58 }
 0x2ec   : > { %v1241_v30 = vpop.permute.xlu2 %1240  ;;  %1639 = vmatmul.msk.f32.vlgmr.msra.gmra.mxu0 %vm376_vm1, %v863_v29 }
 0x2ed   : > { %1649 = vmatpush.xpose.msk.msrb.mxu0 %vm376_vm1, %v1117_v26 }
 0x2ef   : > { %1644 = vmatpush.xpose.msk.msrb.mxu3 %vm376_vm1, %v991_v17 }
 0x2f1   : > { %v647_v31 = vpop.f32.mrf.mxu0 }
 0x2f2   : > { %v650_v32 = vpop.f32.mrf.mxu1  ;;  %1622 = vmatmul.msk.f32.gmra.mxu3 %vm376_vm1, %v2322_v36  ;;  %v653_v33 = vsel %vm408_vm2, %v647_v31, -inf  ;;  %v2386_v36 = vpack.i.bf16 %v2289_v27, %v2291_v28 }
 0x2f3   : > { %654 = vmax.xlane.f32.xlu1 %v653_v33  ;;  %v656_v35 = vsel %vm408_vm2, %v650_v32, -inf }
 0x2f4   : > { %657 = vmax.xlane.f32.xlu0 %v656_v35  ;;  %v1235_v37 = vpop.permute.xlu2 %1234  ;;  %1640 = vmatmul.msk.f32.gmra.mxu0 %vm376_vm1, %v865_v34 }
 0x2fa   : > { %1633 = vmatmul.msk.f32.vlgmr.msra.gmra.mxu3 %vm376_vm1, %v2354_v55 }
 0x2fb   : > { %1655 = vmatpush.xpose.msk.msra.mxu3 %vm376_vm1, %v1241_v30 }
 0x2fc   : > { %v1115_v38 = vpop.permute.xlu2 %1114 }
 0x2fd   : > { %1650 = vmatpush.xpose.msk.msrb.mxu0 %vm376_vm1, %v1115_v38 }
 0x2ff   : > { %1656 = vmatpush.xpose.msk.msra.mxu3 %vm376_vm1, %v1239_v21 }
 0x300   : > { %1651 = vmatmul.msk.f32.vlgmr.msrb.gmra.mxu0 %vm376_vm1, %v1111_v39 }
 0x302   : > { %1634 = vmatmul.msk.f32.gmra.mxu3 %vm376_vm1, %v741_v3 }
 0x304   : > { %v1113_v40 = vpop.permute.xlu2 %1112 }
 0x308   : > { %1652 = vmatmul.msk.f32.gmra.mxu0 %vm376_vm1, %v1113_v40  ;;  %1770 = vrot.lane.b32.xlu0 %v2386_v36, %s2072_s24 }
 0x30a   : > { %1645 = vmatmul.msk.f32.vlgmr.msrb.gmra.mxu3 %vm376_vm1, %v987_v7 }
 0x312   : > { %1646 = vmatmul.msk.f32.gmra.mxu3 %vm376_vm1, %v2356_v6 }
 0x31a   : > { %1657 = vmatmul.msk.f32.vlgmr.msra.gmra.mxu3 %vm376_vm1, %v1235_v37 }
 0x322   : > { %1658 = vmatmul.msk.f32.gmra.mxu3 %vm376_vm1, %v1237_v41 }
 0x35d   : > { %v2396_v42 = vpop.f32.mrf.mxu3 }
 0x365   : > { %v2398_v27 = vpop.f32.mrf.mxu3 }
 0x366   : > { %v655_v50 = vpop.xlane.xlu1 %654 }
 0x367   : > { %v658_v46 = vpop.xlane.xlu0 %657  ;;  %v659_v53 = vsub.f32 %v647_v31, %v655_v50 }
 0x368   : > { %v660_v60 = vsub.f32 %v650_v32, %v658_v46 }
 0x369   : > { %v895_v28 = vpop.f32.mrf.mxu0  ;;  %v661_v59 = vmul.f32 1.442695, %v659_v53 }
 0x36a   : > { %v901_v43 = vsel %vm408_vm2, %v895_v28, -inf  ;;  %v663_v1 = vmul.f32 1.442695, %v660_v60 }
 0x36b   : > { %902 = vmax.xlane.f32.xlu2 %v901_v43  ;;  %1813 = vpow2.f32 %v661_v59 }
 0x36c   : > { %1815 = vpow2.f32 %v663_v1 }
 0x36d   : > { %v2401_v44 = vpop.f32.mrf.mxu3 }
 0x36e   : > { %v527_v6 = vsel %vm408_vm2, %v2401_v44, -inf }
 0x371   : > { %v898_v45 = vpop.f32.mrf.mxu0  ;;  %v2421_v2 = vpop.eup %1813 }
 0x372   : > { %v904_v47 = vsel %vm408_vm2, %v898_v45, -inf  ;;  %v665_v3 = vsel %vm408_vm2, %v2421_v2, 0.0  ;;  %v2425_v4 = vpop.eup %1815 }
 0x373   : > { %905 = vmax.xlane.f32.xlu1 %v904_v47  ;;  %v668_v5 = vsel %vm408_vm2, %v2425_v4, 0.0 }
 0x375   : > { %v2404_v48 = vpop.f32.mrf.mxu3 }
 0x376   : > { %v530_v49 = vsel %vm408_vm2, %v2404_v48, -inf }
 0x377   : > { %531 = vmax.xlane.f32.xlu0 %v530_v49 }
 0x37a   : > { %v1771_v51 = vpop.permute.xlu0 %1770 }
 0x37b   : > { %v1772_v52 = vunpack.i.l.bf16 %v1771_v51  ;;  %v1773_v58 = vunpack.i.h.bf16 %v1771_v51 }
 0x37d   : > { %v2408_v54 = vpop.f32.mrf.mxu3  ;;  %v1143_v55 = vpop.f32.mrf.mxu0  ;;  %605 = vmatpush.msrb.mxu2 %v1772_v52 }
 0x37e   : > { %v777_v56 = vsel %vm408_vm2, %v2408_v54, -inf  ;;  %v1149_v57 = vsel %vm408_vm2, %v1143_v55, -inf }
 0x37f   : > { %778 = vmax.xlane.f32.xlu2 %v777_v56  ;;  %1150 = vmax.xlane.f32.xlu1 %v1149_v57 }
 0x380   : > { %606 = vmatpush.msrb.mxu2 %v1773_v58 }
 0x385   : > { %v2413_v61 = vpop.f32.mrf.mxu3  ;;  %v2415_v62 = vpop.f32.mrf.mxu0 }
 0x386   : > { %v780_v63 = vsel %vm408_vm2, %v2413_v61, -inf  ;;  %v1152_v0 = vsel %vm408_vm2, %v2415_v62, -inf }
 0x387   : > { %781 = vmax.xlane.f32.xlu2 %v780_v63  ;;  %1153 = vmax.xlane.f32.xlu1 %v1152_v0 }
 0x38d   : > { %v2433_v7 = vpop.f32.mrf.mxu3 }
 0x38e   : > { %v1025_v8 = vsel %vm408_vm2, %v2433_v7, -inf }
 0x38f   : > { %666 = vadd.xlane.f32.xlu1 %v665_v3 }
 0x395   : > { %v2443_v17 = vpop.f32.mrf.mxu3 }
 0x396   : > { %v1028_v22 = vsel %vm408_vm2, %v2443_v17, -inf }
 0x397   : > { %669 = vadd.xlane.f32.xlu1 %v668_v5 }
 0x39d   : > { %v2453_v24 = vpop.f32.mrf.mxu3 }
 0x39e   : > { %v1273_v30 = vsel %vm408_vm2, %v2453_v24, -inf }
 0x39f   : > { %1780 = vrot.lane.b32.xlu2 %v2386_v36, %s2078_s6  ;;  %528 = vmax.xlane.f32.xlu1 %v527_v6 }
 0x3a5   : > { %v2463_v32 = vpop.f32.mrf.mxu3 }
 0x3a6   : > { %v1276_v37 = vsel %vm408_vm2, %v2463_v32, -inf }
 0x3a7   : > { %1026 = vmax.xlane.f32.xlu1 %v1025_v8 }
 0x3c0   : > { %1775 = vrot.lane.b32.xlu1 %v2386_v36, %s2074_s28 }
 0x3de   : > { %v903_v9 = vpop.xlane.xlu2 %902 }
 0x3df   : > { %v907_v10 = vsub.f32 %v895_v28, %v903_v9 }
 0x3e1   : > { %v909_v11 = vmul.f32 1.442695, %v907_v10 }
 0x3e3   : > { %1817 = vpow2.f32 %v909_v11 }
 0x3e6   : > { %v906_v12 = vpop.xlane.xlu1 %905 }
 0x3e7   : > { %v908_v13 = vsub.f32 %v898_v45, %v906_v12 }
 0x3e9   : > { %v2439_v14 = vpop.eup %1817  ;;  %v911_v15 = vmul.f32 1.442695, %v908_v13 }
 0x3ea   : > { %v913_v16 = vsel %vm408_vm2, %v2439_v14, 0.0  ;;  %v532_v51 = vpop.xlane.xlu0 %531 }
 0x3eb   : > { %1819 = vpow2.f32 %v911_v15  ;;  %914 = vadd.xlane.f32.xlu0 %v913_v16  ;;  %v534_v60 = vsub.f32 %v2404_v48, %v532_v51 }
 0x3ed   : > { %v537_v9 = vmul.f32 1.442695, %v534_v60 }
 0x3f1   : > { %v2445_v18 = vpop.eup %1819 }
 0x3f2   : > { %v2447_v19 = vpop.xlane.xlu2 %778  ;;  %v1151_v20 = vpop.xlane.xlu1 %1150  ;;  %v916_v21 = vsel %vm408_vm2, %v2445_v18, 0.0 }
 0x3f3   : > { %v1155_v23 = vsub.f32 %v1143_v55, %v1151_v20  ;;  %917 = vadd.xlane.f32.xlu2 %v916_v21  ;;  %1029 = vmax.xlane.f32.xlu0 %v1028_v22  ;;  %v783_v21 = vsub.f32 %v2408_v54, %v2447_v19 }
 0x3f5   : > { %v1157_v25 = vmul.f32 1.442695, %v1155_v23 }
 0x3f7   : > { %1821 = vpow2.f32 %v1157_v25 }
 0x3fa   : > { %v2455_v26 = vpop.xlane.xlu2 %781  ;;  %v2457_v29 = vpop.xlane.xlu1 %1153 }
 0x3fb   : > { %1274 = vmax.xlane.f32.xlu2 %v1273_v30  ;;  %v785_v30 = vmul.f32 1.442695, %v783_v21 }
 0x3fd   : > { %v2461_v31 = vpop.eup %1821 }
 0x3fe   : > { %v1161_v33 = vsel %vm408_vm2, %v2461_v31, 0.0 }
 0x3ff   : > { %1162 = vadd.xlane.f32.xlu1 %v1161_v33 }
 0x402   : > { %v1781_v34 = vpop.permute.xlu2 %1780  ;;  %v667_v35 = vpop.xlane.xlu1 %666 }
 0x403   : > { %v1782_v38 = vunpack.i.l.bf16 %v1781_v34  ;;  %v671_v39 = vmul.f32 8.0, %v667_v35  ;;  %1277 = vmax.xlane.f32.xlu2 %v1276_v37  ;;  %v1783_v40 = vunpack.i.h.bf16 %v1781_v34 }
 0x405   : > { %1823 = vrcp.f32 %v671_v39  ;;  %729 = vmatpush.msra.mxu1 %v1782_v38  ;;  %v684_v47 = vand.u32 2147483648, %v671_v39  ;;  %v682_v50 = vand.u32 2147483647, %v671_v39  ;;  %vm678_vm12 = vweird.f32 %v671_v39 }
 0x407   : > { %730 = vmatpush.msra.mxu1 %v1783_v40  ;;  %v685_v56 = vor.u32 1.1754944e-38, %v684_v47  ;;  %vm683_vm14 = vcmp.eq.f32.partialorder %v682_v50, 8.507059e+37 }
 0x40a   : > { %v670_v41 = vpop.xlane.xlu1 %669 }
 0x40b   : > { %v1824_v28 = vpop.eup %1823  ;;  %v672_v43 = vmul.f32 8.0, %v670_v41 }
 0x40c   : > { %v674_v45 = vmul.f32 %v1824_v28, %v671_v39  ;;  %vm679_vm11 = vweird.f32 %v1824_v28 }
 0x40d   : > { %1825 = vrcp.f32 %v672_v43  ;;  %vm680_vm13 = vmor %vm678_vm12, %vm679_vm11  ;;  %v698_v5 = vand.u32 2147483648, %v672_v43  ;;  %v696_v8 = vand.u32 2147483647, %v672_v43  ;;  %vm692_vm3 = vweird.f32 %v672_v43 }
 0x40e   : > { %v675_v46 = vsub.f32 1.0, %v674_v45 }
 0x40f   : > { %vm697_vm5 = vcmp.eq.f32.partialorder %v696_v8, 8.507059e+37 }
 0x410   : > { %v676_v49 = vmul.f32 %v1824_v28, %v675_v46  ;;  %v1156_v46 = vsub.f32 %v2415_v62, %v2457_v29 }
 0x412   : > { %v677_v52 = vadd.f32 %v1824_v28, %v676_v49  ;;  %v529_v53 = vpop.xlane.xlu1 %528  ;;  %v1159_v50 = vmul.f32 1.442695, %v1156_v46 }
 0x413   : > { %v1826_v55 = vpop.eup %1825  ;;  %v533_v57 = vsub.f32 %v2401_v44, %v529_v53  ;;  %v699_v44 = vor.u32 1.1754944e-38, %v698_v5 }
 0x414   : > { %v688_v58 = vmul.f32 %v1826_v55, %v672_v43  ;;  %v681_v59 = vsel %vm680_vm13, %v1824_v28, %v677_v52  ;;  %vm693_vm15 = vweird.f32 %v1826_v55 }
 0x415   : > { %v535_v63 = vmul.f32 1.442695, %v533_v57  ;;  %v686_v0 = vsel %vm683_vm14, %v685_v56, %v681_v59  ;;  %vm694_vm4 = vmor %vm692_vm3, %vm693_vm15 }
 0x416   : > { %v689_v1 = vsub.f32 1.0, %v688_v58  ;;  %v701_v3 = vmul.f32 %v2421_v2, %v686_v0 }
 0x417   : > { %1827 = vpow2.f32 %v535_v63 }
 0x418   : > { %1629 = vmatmul.msk.f32.vlgmr.msra.gmra.mxu1 %vm408_vm2, %v701_v3  ;;  %v690_v6 = vmul.f32 %v1826_v55, %v689_v1  ;;  %1829 = vpow2.f32 %v537_v9 }
 0x419   : > { %1831 = vpow2.f32 %v785_v30 }
 0x41a   : > { %v691_v10 = vadd.f32 %v1826_v55, %v690_v6  ;;  %v1027_v20 = vpop.xlane.xlu1 %1026 }
 0x41b   : > { %1790 = vrot.lane.b32.xlu2 %v2386_v36, %s2085_s11  ;;  %v1031_v35 = vsub.f32 %v2433_v7, %v1027_v20 }
 0x41c   : > { %v695_v48 = vsel %vm694_vm4, %v1826_v55, %v691_v10 }
 0x41d   : > { %v2475_v11 = vpop.eup %1827  ;;  %v700_v2 = vsel %vm697_vm5, %v699_v44, %v695_v48  ;;  %v1033_v19 = vmul.f32 1.442695, %v1031_v35 }
 0x41e   : > { %v539_v12 = vsel %vm408_vm2, %v2475_v11, 0.0  ;;  %v702_v13 = vmul.f32 %v2425_v4, %v700_v2  ;;  %v2481_v15 = vpop.eup %1829  ;;  %v784_v4 = vsub.f32 %v2413_v61, %v2455_v26 }
 0x41f   : > { %540 = vadd.xlane.f32.xlu0 %v539_v12  ;;  %v542_v16 = vsel %vm408_vm2, %v2481_v15, 0.0  ;;  %v2491_v34 = vpop.eup %1831 }
 0x420   : > { %1630 = vmatmul.msk.f32.gmra.mxu1 %vm408_vm2, %v702_v13  ;;  %v787_v33 = vmul.f32 1.442695, %v784_v4  ;;  %v789_v54 = vsel %vm408_vm2, %v2491_v34, 0.0 }
 0x422   : > { %1833 = vpow2.f32 %v787_v33 }
 0x423   : > { %1835 = vpow2.f32 %v1033_v19 }
 0x427   : > { %543 = vadd.xlane.f32.xlu0 %v542_v16 }
 0x428   : > { %v2496_v37 = vpop.eup %1833 }
 0x429   : > { %v792_v61 = vsel %vm408_vm2, %v2496_v37, 0.0  ;;  %v2500_v26 = vpop.eup %1835 }
 0x42a   : > { %v1037_v38 = vsel %vm408_vm2, %v2500_v26, 0.0 }
 0x432   : > { %v1776_v22 = vpop.permute.xlu1 %1775 }
 0x433   : > { %v1777_v23 = vunpack.i.l.bf16 %v1776_v22  ;;  %v1778_v25 = vunpack.i.h.bf16 %v1776_v22 }
 0x435   : > { %853 = vmatpush.msra.mxu2 %v1777_v23 }
 0x437   : > { %854 = vmatpush.msra.mxu2 %v1778_v25 }
 0x43b   : > { %1785 = vrot.lane.b32.xlu0 %v2386_v36, %s2079_s13 }
 0x444   : > { %790 = vadd.xlane.f32.xlu2 %v789_v54 }
 0x44c   : > { %793 = vadd.xlane.f32.xlu2 %v792_v61 }
 0x454   : > { %1038 = vadd.xlane.f32.xlu2 %v1037_v38 }
 0x45e   : > { %v915_v39 = vpop.xlane.xlu0 %914 }
 0x45f   : > { %v919_v7 = vmul.f32 8.0, %v915_v39 }
 0x461   : > { %1837 = vrcp.f32 %v919_v7  ;;  %v932_v1 = vand.u32 2147483648, %v919_v7  ;;  %vm926_vm7 = vweird.f32 %v919_v7  ;;  %v930_v5 = vand.u32 2147483647, %v919_v7 }
 0x463   : > { %v933_v10 = vor.u32 1.1754944e-38, %v932_v1  ;;  %vm931_vm9 = vcmp.eq.f32.partialorder %v930_v5, 8.507059e+37 }
 0x466   : > { %v918_v40 = vpop.xlane.xlu2 %917  ;;  %v1030_v41 = vpop.xlane.xlu0 %1029 }
 0x467   : > { %v920_v28 = vmul.f32 8.0, %v918_v40  ;;  %v1032_v43 = vsub.f32 %v2443_v17, %v1030_v41  ;;  %v1838_v45 = vpop.eup %1837 }
 0x468   : > { %v922_v49 = vmul.f32 %v1838_v45, %v919_v7  ;;  %vm927_vm6 = vweird.f32 %v1838_v45 }
 0x469   : > { %v1035_v47 = vmul.f32 1.442695, %v1032_v43  ;;  %1839 = vrcp.f32 %v920_v28  ;;  %vm928_vm8 = vmor %vm926_vm7, %vm927_vm6  ;;  %v946_v20 = vand.u32 2147483648, %v920_v28  ;;  %vm940_vm11 = vweird.f32 %v920_v28 }
 0x46a   : > { %v923_v55 = vsub.f32 1.0, %v922_v49  ;;  %v944_v23 = vand.u32 2147483647, %v920_v28 }
 0x46b   : > { %1841 = vpow2.f32 %v1035_v47  ;;  %v947_v30 = vor.u32 1.1754944e-38, %v946_v20 }
 0x46c   : > { %1800 = vrot.lane.b32.xlu2 %v2386_v36, %s2082_s15  ;;  %1843 = vpow2.f32 %v1159_v50  ;;  %v924_v29 = vmul.f32 %v1838_v45, %v923_v55  ;;  %vm945_vm13 = vcmp.eq.f32.partialorder %v944_v23, 8.507059e+37 }
 0x46e   : > { %v1275_v51 = vpop.xlane.xlu2 %1274  ;;  %v925_v63 = vadd.f32 %v1838_v45, %v924_v29 }
 0x46f   : > { %v1279_v52 = vsub.f32 %v2453_v24, %v1275_v51  ;;  %v1840_v53 = vpop.eup %1839 }
 0x470   : > { %v936_v57 = vmul.f32 %v1840_v53, %v920_v28  ;;  %vm941_vm10 = vweird.f32 %v1840_v53 }
 0x471   : > { %v2510_v56 = vpop.eup %1841  ;;  %v1281_v17 = vmul.f32 1.442695, %v1279_v52  ;;  %vm942_vm12 = vmor %vm940_vm11, %vm941_vm10 }
 0x472   : > { %v1040_v62 = vsel %vm408_vm2, %v2510_v56, 0.0  ;;  %v2514_v59 = vpop.eup %1843  ;;  %v937_v24 = vsub.f32 1.0, %v936_v57  ;;  %v1163_v57 = vpop.xlane.xlu1 %1162 }
 0x473   : > { %1845 = vpow2.f32 %v1281_v17  ;;  %1041 = vadd.xlane.f32.xlu1 %v1040_v62  ;;  %v1164_v8 = vsel %vm408_vm2, %v2514_v59, 0.0  ;;  %v1167_v1 = vmul.f32 8.0, %v1163_v57 }
 0x474   : > { %v938_v9 = vmul.f32 %v1840_v53, %v937_v24 }
 0x476   : > { %v1278_v58 = vpop.xlane.xlu2 %1277  ;;  %v939_v12 = vadd.f32 %v1840_v53, %v938_v9 }
 0x477   : > { %v1280_v60 = vsub.f32 %v2463_v32, %v1278_v58  ;;  %v929_v32 = vsel %vm928_vm8, %v1838_v45, %v925_v63 }
 0x478   : > { %v934_v2 = vsel %vm931_vm9, %v933_v10, %v929_v32  ;;  %v943_v25 = vsel %vm942_vm12, %v1840_v53, %v939_v12 }
 0x479   : > { %v2517_v0 = vpop.eup %1845  ;;  %v1283_v3 = vmul.f32 1.442695, %v1280_v60  ;;  %v949_v22 = vmul.f32 %v2439_v14, %v934_v2  ;;  %v948_v4 = vsel %vm945_vm13, %v947_v30, %v943_v25 }
 0x47a   : > { %v1285_v6 = vsel %vm408_vm2, %v2517_v0, 0.0  ;;  %v950_v33 = vmul.f32 %v2445_v18, %v948_v4 }
 0x47b   : > { %1847 = vpow2.f32 %v1283_v3  ;;  %1286 = vadd.xlane.f32.xlu0 %v1285_v6  ;;  %1165 = vadd.xlane.f32.xlu1 %v1164_v8 }
 0x47e   : > { %v1791_v44 = vpop.permute.xlu2 %1790 }
 0x47f   : > { %v1792_v48 = vunpack.i.l.bf16 %v1791_v44  ;;  %v1793_v16 = vunpack.i.h.bf16 %v1791_v44 }
 0x481   : > { %v2523_v13 = vpop.eup %1847  ;;  %977 = vmatpush.msrb.mxu1 %v1792_v48 }
 0x482   : > { %v1288_v21 = vsel %vm408_vm2, %v2523_v13, 0.0 }
 0x483   : > { %978 = vmatpush.msrb.mxu1 %v1793_v16  ;;  %1289 = vadd.xlane.f32.xlu0 %v1288_v21 }
 0x484   : > { %1641 = vmatmul.msk.f32.vlgmr.msrb.gmra.mxu1 %vm408_vm2, %v949_v22 }
 0x48c   : > { %1642 = vmatmul.msk.f32.gmra.mxu1 %vm408_vm2, %v950_v33 }
 0x492   : > { %v541_v35 = vpop.xlane.xlu0 %540 }
 0x493   : > { %v545_v54 = vmul.f32 8.0, %v541_v35 }
 0x494   : > { %1795 = vrot.lane.b32.xlu1 %v2386_v36, %s2086_s29  ;;  %s2009_s29 = scalar_lea.hbm %s2635_s5, 32 }
 0x495   : > { %1849 = vrcp.f32 %v545_v54  ;;  %v732_v14 = vpop.f32.mrf.mxu1  ;;  %v558_v40 = vand.u32 2147483648, %v545_v54  ;;  %v556_v18 = vand.u32 2147483647, %v545_v54  ;;  %vm552_vm15 = vweird.f32 %v545_v54 }
 0x497   : > { %v559_v36 = vor.u32 1.1754944e-38, %v558_v40  ;;  %vm557_vm4 = vcmp.eq.f32.partialorder %v556_v18, 8.507059e+37 }
 0x49a   : > { %v544_v19 = vpop.xlane.xlu0 %543 }
 0x49b   : > { %v1850_v61 = vpop.eup %1849  ;;  %v546_v38 = vmul.f32 8.0, %v544_v19 }
 0x49c   : > { %v548_v39 = vmul.f32 %v1850_v61, %v545_v54  ;;  %1368 = vrot.lane.b32.xlu1 %v732_v14, %s2081_s14  ;;  %vm553_vm14 = vweird.f32 %v1850_v61  ;;  %v1180_v54 = vand.u32 2147483648, %v1167_v1  ;;  %v1178_v14 = vand.u32 2147483647, %v1167_v1 }
 0x49d   : > { %1851 = vrcp.f32 %v546_v38  ;;  %v735_v45 = vpop.f32.mrf.mxu1  ;;  %vm554_vm3 = vmor %vm552_vm15, %vm553_vm14  ;;  %v572_v52 = vand.u32 2147483648, %v546_v38  ;;  %v570_v55 = vand.u32 2147483647, %v546_v38  ;;  %vm566_vm6 = vweird.f32 %v546_v38 }
 0x49e   : > { %v549_v7 = vsub.f32 1.0, %v548_v39  ;;  %1853 = vrcp.f32 %v1167_v1  ;;  %vm1174_vm14 = vweird.f32 %v1167_v1 }
 0x49f   : > { %v573_v62 = vor.u32 1.1754944e-38, %v572_v52  ;;  %vm571_vm8 = vcmp.eq.f32.partialorder %v570_v55, 8.507059e+37 }
 0x4a0   : > { %v550_v41 = vmul.f32 %v1850_v61, %v549_v7 }
 0x4a2   : > { %v551_v28 = vadd.f32 %v1850_v61, %v550_v41 }
 0x4a3   : > { %v1852_v43 = vpop.eup %1851 }
 0x4a4   : > { %v562_v46 = vmul.f32 %v1852_v43, %v546_v38  ;;  %1370 = vrot.lane.b32.xlu1 %v735_v45, %s2081_s14  ;;  %v555_v47 = vsel %vm554_vm3, %v1850_v61, %v551_v28  ;;  %vm567_vm5 = vweird.f32 %v1852_v43  ;;  %v1854_v6 = vpop.eup %1853  ;;  %v1181_v28 = vor.u32 1.1754944e-38, %v1180_v54 }
 0x4a5   : > { %v560_v49 = vsel %vm557_vm4, %v559_v36, %v555_v47  ;;  %vm568_vm7 = vmor %vm566_vm6, %vm567_vm5  ;;  %v1170_v8 = vmul.f32 %v1854_v6, %v1167_v1  ;;  %vm1175_vm11 = vweird.f32 %v1854_v6  ;;  %vm1179_vm4 = vcmp.eq.f32.partialorder %v1178_v14, 8.507059e+37 }
 0x4a6   : > { %v563_v50 = vsub.f32 1.0, %v562_v46  ;;  %v575_v51 = vmul.f32 %v2475_v11, %v560_v49  ;;  %vm2539_vm15 = vmor %vm1174_vm14, %vm1175_vm11 }
 0x4a7   : > { %v1171_v44 = vsub.f32 1.0, %v1170_v8 }
 0x4a8   : > { %1623 = vmatmul.msk.f32.vlgmr.msrb.gmra.mxu2 %vm408_vm2, %v575_v51  ;;  %v564_v53 = vmul.f32 %v1852_v43, %v563_v50 }
 0x4aa   : > { %v565_v17 = vadd.f32 %v1852_v43, %v564_v53 }
 0x4ac   : > { %v569_v29 = vsel %vm568_vm7, %v1852_v43, %v565_v17 }
 0x4ad   : > { %v1786_v58 = vpop.permute.xlu0 %1785  ;;  %v574_v60 = vsel %vm571_vm8, %v573_v62, %v569_v29 }
 0x4ae   : > { %v1787_v63 = vunpack.i.l.bf16 %v1786_v58  ;;  %v576_v24 = vmul.f32 %v2481_v15, %v574_v60  ;;  %v1788_v11 = vunpack.i.h.bf16 %v1786_v58  ;;  %v1172_v15 = vmul.f32 %v1854_v6, %v1171_v44 }
 0x4b0   : > { %1624 = vmatmul.msk.f32.gmra.mxu2 %vm408_vm2, %v576_v24  ;;  %v1173_v30 = vadd.f32 %v1854_v6, %v1172_v15 }
 0x4b1   : > { %1101 = vmatpush.msrb.mxu2 %v1787_v63 }
 0x4b2   : > { %v1177_v18 = vsel %vm2539_vm15, %v1854_v6, %v1173_v30 }
 0x4b3   : > { %1102 = vmatpush.msrb.mxu2 %v1788_v11  ;;  %v1182_v49 = vsel %vm1179_vm4, %v1181_v28, %v1177_v18 }
 0x4b4   : > { %v1197_v17 = vmul.f32 %v2461_v31, %v1182_v49 }
 0x4b7   : > { %v791_v3 = vpop.xlane.xlu2 %790 }
 0x4b8   : > { %v795_v5 = vmul.f32 8.0, %v791_v3 }
 0x4ba   : > { %1855 = vrcp.f32 %v795_v5  ;;  %v808_v16 = vand.u32 2147483648, %v795_v5  ;;  %v806_v20 = vand.u32 2147483647, %v795_v5  ;;  %vm802_vm10 = vweird.f32 %v795_v5 }
 0x4bc   : > { %v809_v4 = vor.u32 1.1754944e-38, %v808_v16  ;;  %vm807_vm13 = vcmp.eq.f32.partialorder %v806_v20, 8.507059e+37 }
 0x4bf   : > { %v794_v32 = vpop.xlane.xlu2 %793 }
 0x4c0   : > { %v1856_v9 = vpop.eup %1855  ;;  %v796_v10 = vmul.f32 8.0, %v794_v32 }
 0x4c1   : > { %v798_v48 = vmul.f32 %v1856_v9, %v795_v5  ;;  %vm803_vm9 = vweird.f32 %v1856_v9 }
 0x4c2   : > { %1857 = vrcp.f32 %v796_v10  ;;  %vm804_vm12 = vmor %vm802_vm10, %vm803_vm9  ;;  %v822_v7 = vand.u32 2147483648, %v796_v10  ;;  %v820_v41 = vand.u32 2147483647, %v796_v10  ;;  %vm816_vm5 = vweird.f32 %v796_v10 }
 0x4c3   : > { %v799_v2 = vsub.f32 1.0, %v798_v48 }
 0x4c4   : > { %v823_v47 = vor.u32 1.1754944e-38, %v822_v7  ;;  %vm821_vm7 = vcmp.eq.f32.partialorder %v820_v41, 8.507059e+37 }
 0x4c5   : > { %v800_v12 = vmul.f32 %v1856_v9, %v799_v2 }
 0x4c7   : > { %v801_v21 = vadd.f32 %v1856_v9, %v800_v12  ;;  %v1039_v22 = vpop.xlane.xlu2 %1038 }
 0x4c8   : > { %v1858_v23 = vpop.eup %1857  ;;  %v1043_v25 = vmul.f32 8.0, %v1039_v22 }
 0x4c9   : > { %v812_v33 = vmul.f32 %v1858_v23, %v796_v10  ;;  %v805_v35 = vsel %vm804_vm12, %v1856_v9, %v801_v21  ;;  %vm817_vm3 = vweird.f32 %v1858_v23 }
 0x4ca   : > { %1859 = vrcp.f32 %v1043_v25  ;;  %v810_v61 = vsel %vm807_vm13, %v809_v4, %v805_v35  ;;  %vm818_vm6 = vmor %vm816_vm5, %vm817_vm3  ;;  %v1056_v62 = vand.u32 2147483648, %v1043_v25  ;;  %v1054_v57 = vand.u32 2147483647, %v1043_v25 }
 0x4cb   : > { %v813_v19 = vsub.f32 1.0, %v812_v33  ;;  %v825_v39 = vmul.f32 %v2491_v34, %v810_v61  ;;  %vm1050_vm9 = vweird.f32 %v1043_v25 }
 0x4cc   : > { %v1057_v60 = vor.u32 1.1754944e-38, %v1056_v62  ;;  %vm1055_vm11 = vcmp.eq.f32.partialorder %v1054_v57, 8.507059e+37 }
 0x4cd   : > { %v814_v40 = vmul.f32 %v1858_v23, %v813_v19  ;;  %1635 = vmatmul.msk.f32.vlgmr.msra.gmra.mxu2 %vm408_vm2, %v825_v39 }
 0x4cf   : > { %v1801_v43 = vpop.permute.xlu2 %1800  ;;  %v815_v45 = vadd.f32 %v1858_v23, %v814_v40 }
 0x4d0   : > { %v1860_v36 = vpop.eup %1859  ;;  %v1802_v46 = vunpack.i.l.bf16 %v1801_v43  ;;  %v1803_v51 = vunpack.i.h.bf16 %v1801_v43 }
 0x4d1   : > { %v1046_v34 = vmul.f32 %v1860_v36, %v1043_v25  ;;  %v819_v50 = vsel %vm818_vm6, %v1858_v23, %v815_v45  ;;  %vm1051_vm8 = vweird.f32 %v1860_v36 }
 0x4d2   : > { %1225 = vmatpush.msra.mxu1 %v1802_v46  ;;  %v824_v52 = vsel %vm821_vm7, %v823_v47, %v819_v50  ;;  %vm1052_vm10 = vmor %vm1050_vm9, %vm1051_vm8 }
 0x4d3   : > { %v1047_v53 = vsub.f32 1.0, %v1046_v34  ;;  %v826_v55 = vmul.f32 %v2496_v37, %v824_v52 }
 0x4d4   : > { %1226 = vmatpush.msra.mxu1 %v1803_v51 }
 0x4d5   : > { %v1048_v29 = vmul.f32 %v1860_v36, %v1047_v53  ;;  %1653 = vmatmul.msk.f32.vlgmr.msra.gmra.mxu1 %vm408_vm2, %v1197_v17  ;;  %1636 = vmatmul.msk.f32.gmra.mxu2 %vm408_vm2, %v826_v55 }
 0x4d7   : > { %v1049_v58 = vadd.f32 %v1860_v36, %v1048_v29 }
 0x4d9   : > { %v1053_v63 = vsel %vm1052_vm10, %v1860_v36, %v1049_v58 }
 0x4da   : > { %v1058_v24 = vsel %vm1055_vm11, %v1057_v60, %v1053_v63 }
 0x4db   : > { %v1073_v37 = vmul.f32 %v2500_v26, %v1058_v24 }
 0x4dd   : > { %1647 = vmatmul.msk.f32.vlgmr.msrb.gmra.mxu2 %vm408_vm2, %v1073_v37 }
 0x4e6   : > { %v1042_v31 = vpop.xlane.xlu1 %1041 }
 0x4e7   : > { %v1044_v1 = vmul.f32 8.0, %v1042_v31 }
 0x4e9   : > { %1861 = vrcp.f32 %v1044_v1  ;;  %v1070_v10 = vand.u32 2147483648, %v1044_v1  ;;  %v1068_v48 = vand.u32 2147483647, %v1044_v1  ;;  %vm1064_vm13 = vweird.f32 %v1044_v1 }
 0x4eb   : > { %v1071_v16 = vor.u32 1.1754944e-38, %v1070_v10  ;;  %vm1069_vm15 = vcmp.eq.f32.partialorder %v1068_v48, 8.507059e+37  ;;  %v1435_v48 = vld [vmem:[#allocation8 + $0x10] sm:$0xff] }
 0x4ee   : > { %v1166_v11 = vpop.xlane.xlu1 %1165  ;;  %v1287_v3 = vpop.xlane.xlu0 %1286 }
 0x4ef   : > { %v1862_v5 = vpop.eup %1861  ;;  %v1168_v6 = vmul.f32 8.0, %v1166_v11  ;;  %v1291_v8 = vmul.f32 8.0, %v1287_v3 }
 0x4f0   : > { %v1060_v32 = vmul.f32 %v1862_v5, %v1044_v1  ;;  %vm1065_vm12 = vweird.f32 %v1862_v5 }
 0x4f1   : > { %1863 = vrcp.f32 %v1168_v6  ;;  %vm1066_vm14 = vmor %vm1064_vm13, %vm1065_vm12  ;;  %v1192_v35 = vand.u32 2147483647, %v1168_v6  ;;  %v1194_v54 = vand.u32 2147483648, %v1168_v6  ;;  %vm1188_vm4 = vweird.f32 %v1168_v6 }
 0x4f2   : > { %v1061_v9 = vsub.f32 1.0, %v1060_v32  ;;  %1865 = vrcp.f32 %v1291_v8  ;;  %v1304_v18 = vand.u32 2147483648, %v1291_v8  ;;  %vm1298_vm8 = vweird.f32 %v1291_v8  ;;  %v1438_v32 = vld [vmem:[#allocation8 + $0x28] sm:$0xff] }
 0x4f3   : > { %vm1193_vm6 = vcmp.eq.f32.partialorder %v1192_v35, 8.507059e+37  ;;  %v1195_v39 = vor.u32 1.1754944e-38, %v1194_v54  ;;  %v1302_v43 = vand.u32 2147483647, %v1291_v8 }
 0x4f4   : > { %v1062_v44 = vmul.f32 %v1862_v5, %v1061_v9  ;;  %v1305_v49 = vor.u32 1.1754944e-38, %v1304_v18  ;;  %v1437_v9 = vld [vmem:[#allocation8 + $0x20] sm:$0xff] }
 0x4f5   : > { %vm1303_vm10 = vcmp.eq.f32.partialorder %v1302_v43, 8.507059e+37 }
 0x4f6   : > { %v1290_v2 = vpop.xlane.xlu0 %1289  ;;  %v1063_v26 = vadd.f32 %v1862_v5, %v1062_v44  ;;  %v1436_v44 = vld [vmem:[#allocation8 + $0x18] sm:$0xff] }
 0x4f7   : > { %v1864_v15 = vpop.eup %1863  ;;  %v1292_v12 = vmul.f32 8.0, %v1290_v2  ;;  %v1434_v2 = vld [vmem:[#allocation8 + $0x8] sm:$0xff] }
 0x4f8   : > { %v1866_v20 = vpop.eup %1865  ;;  %v1184_v21 = vmul.f32 %v1864_v15, %v1168_v6  ;;  %v1067_v22 = vsel %vm1066_vm14, %v1862_v5, %v1063_v26  ;;  %vm1189_vm3 = vweird.f32 %v1864_v15  ;;  %v1440_v6 = vld [vmem:[#allocation8 + $0x38] sm:$0xff]  ;;  %v1433_v26 = vld [vmem:[#allocation8] sm:$0xff] }
 0x4f9   : > { %v1294_v23 = vmul.f32 %v1866_v20, %v1291_v8  ;;  %1867 = vrcp.f32 %v1292_v12  ;;  %v1072_v25 = vsel %vm1069_vm15, %v1071_v16, %v1067_v22  ;;  %vm1190_vm5 = vmor %vm1188_vm4, %vm1189_vm3  ;;  %vm1299_vm7 = vweird.f32 %v1866_v20  ;;  %v1439_v8 = vld [vmem:[#allocation8 + $0x30] sm:$0xff]  ;;  %1459 = vmatpush.msra.mxu0 %v1440_v6 }
 0x4fa   : > { %v1185_v30 = vsub.f32 1.0, %v1184_v21  ;;  %v1074_v4 = vmul.f32 %v2510_v56, %v1072_v25  ;;  %vm1300_vm9 = vmor %vm1298_vm8, %vm1299_vm7  ;;  %v1318_v55 = vand.u32 2147483648, %v1292_v12  ;;  %vm1312_vm12 = vweird.f32 %v1292_v12 }
 0x4fb   : > { %v1295_v33 = vsub.f32 1.0, %v1294_v23  ;;  %v1316_v62 = vand.u32 2147483647, %v1292_v12  ;;  %1460 = vmatpush.msra.mxu0 %v1439_v8  ;;  %vm1418_vm15 = vcmask 195584   ;;  %vm1421_vm3 = vcmask 261120  }
 0x4fc   : > { %1648 = vmatmul.msk.f32.gmra.mxu2 %vm408_vm2, %v1074_v4  ;;  %v1186_v14 = vmul.f32 %v1864_v15, %v1185_v30  ;;  %v1319_v29 = vor.u32 1.1754944e-38, %v1318_v55  ;;  %vm1424_vm4 = vcmask 326656  }
 0x4fd   : > { %v1296_v19 = vmul.f32 %v1866_v20, %v1295_v33  ;;  %vm1317_vm14 = vcmp.eq.f32.partialorder %v1316_v62, 8.507059e+37  ;;  %1461 = vmatpush.msra.mxu0 %v1438_v32 }
 0x4fe   : > { %v1187_v61 = vadd.f32 %v1864_v15, %v1186_v14 }
 0x4ff   : > { %v1868_v38 = vpop.eup %1867  ;;  %v1297_v7 = vadd.f32 %v1866_v20, %v1296_v19  ;;  %1462 = vmatpush.msra.mxu0 %v1437_v9 }
 0x500   : > { %v1308_v40 = vmul.f32 %v1868_v38, %v1292_v12  ;;  %v1191_v41 = vsel %vm1190_vm5, %v1864_v15, %v1187_v61  ;;  %vm1313_vm11 = vweird.f32 %v1868_v38  ;;  %vm1427_vm5 = vcmask 392192  }
 0x501   : > { %v980_v56 = vpop.f32.mrf.mxu1  ;;  %v1196_v28 = vsel %vm1193_vm6, %v1195_v39, %v1191_v41  ;;  %v1301_v46 = vsel %vm1300_vm9, %v1866_v20, %v1297_v7  ;;  %vm1314_vm13 = vmor %vm1312_vm12, %vm1313_vm11  ;;  %1463 = vmatpush.msra.mxu0 %v1436_v44  ;;  %vm1430_vm6 = vcmask 457728  }
 0x502   : > { %v1309_v45 = vsub.f32 1.0, %v1308_v40  ;;  %1384 = vrot.lane.b32.xlu0 %v980_v56, %s2084_s8  ;;  %v1198_v36 = vmul.f32 %v2514_v59, %v1196_v28  ;;  %v1306_v51 = vsel %vm1303_vm10, %v1305_v49, %v1301_v46 }
 0x503   : > { %v1321_v17 = vmul.f32 %v2517_v0, %v1306_v51  ;;  %1464 = vmatpush.msra.mxu0 %v1435_v48 }
 0x504   : > { %1654 = vmatmul.msk.f32.gmra.mxu1 %vm408_vm2, %v1198_v36  ;;  %v1310_v47 = vmul.f32 %v1868_v38, %v1309_v45  ;;  %v1804_v45 = vld [vmem:[%s2634_s4] ss:$0 sm:$0xff] }
 0x505   : > { %1465 = vmatpush.msra.mxu0 %v1434_v2 }
 0x506   : > { %v1796_v34 = vpop.permute.xlu1 %1795  ;;  %v1311_v52 = vadd.f32 %v1868_v38, %v1310_v47 }
 0x507   : > { %v1797_v50 = vunpack.i.l.bf16 %v1796_v34  ;;  %v1798_v53 = vunpack.i.h.bf16 %v1796_v34  ;;  %1466 = vmatpush.msra.mxu0 %v1433_v26 }
 0x508   : > { %v1315_v59 = vsel %vm1314_vm13, %v1868_v38, %v1311_v52 }
 0x509   : > { %1349 = vmatpush.msra.mxu2 %v1797_v50  ;;  %v1320_v57 = vsel %vm1317_vm14, %v1319_v29, %v1315_v59  ;;  %v983_v24 = vpop.f32.mrf.mxu1 }
 0x50a   : > { %v1322_v58 = vmul.f32 %v2523_v13, %v1320_v57 }
 0x50b   : > { %1350 = vmatpush.msra.mxu2 %v1798_v53 }
 0x50c   : > { %1659 = vmatmul.msk.f32.vlgmr.msra.gmra.mxu2 %vm408_vm2, %v1321_v17 }
 0x50e   : > { %v1369_v12 = vpop.permute.xlu1 %1368 }
 0x514   : > { %1660 = vmatmul.msk.f32.gmra.mxu2 %vm408_vm2, %v1322_v58 }
 0x516   : > { %v1371_v20 = vpop.permute.xlu1 %1370 }
 0x52b   : > { %v608_v60 = vpop.f32.mrf.mxu2 }
 0x533   : > { %v611_v63 = vpop.f32.mrf.mxu2 }
 0x550   : > { %v856_v37 = vpop.f32.mrf.mxu2 }
 0x552   : > { %v1228_v31 = vpop.f32.mrf.mxu1 }
 0x553   : > { %1400 = vrot.lane.b32.xlu2 %v1228_v31, %s2077_s26 }
 0x558   : > { %v859_v0 = vpop.f32.mrf.mxu2 }
 0x559   : > { %1378 = vrot.lane.b32.xlu0 %v859_v0, %s2083_s7 }
 0x55b   : > { %1360 = vrot.lane.b32.xlu2 %v608_v60, %s2080_s12 }
 0x560   : > { %v1104_v1 = vpop.f32.mrf.mxu2 }
 0x561   : > { %1392 = vrot.lane.b32.xlu1 %v1104_v1, %s2076_s23 }
 0x563   : > { %1362 = vrot.lane.b32.xlu2 %v611_v63, %s2080_s12 }
 0x56b   : > { %1376 = vrot.lane.b32.xlu2 %v856_v37, %s2083_s7  ;;  %s1477_s7 = scalar_lea.sflag [#allocation4], %s2233_s17 }
 0x573   : > { %1386 = vrot.lane.b32.xlu2 %v983_v24, %s2084_s8 }
 0x574   : > { %v1385_v30 = vpop.permute.xlu0 %1384 }
 0x57f   : > { %v1107_v11 = vpop.f32.mrf.mxu2 }
 0x581   : > { %v1231_v13 = vpop.f32.mrf.mxu1 }
 0x582   : > { %1402 = vrot.lane.b32.xlu0 %v1231_v13, %s2077_s26 }
 0x58f   : > { %v1352_v3 = vpop.f32.mrf.mxu2 }
 0x590   : > { %1408 = vrot.lane.b32.xlu1 %v1352_v3, %s2075_s16 }
 0x597   : > { %v1355_v5 = vpop.f32.mrf.mxu2 }
 0x598   : > { %1394 = vrot.lane.b32.xlu1 %v1107_v11, %s2076_s23  ;;  %1410 = vrot.lane.b32.xlu2 %v1355_v5, %s2075_s16  ;;  %s1669_s16 = sshll.u32 %s2139_s22, 4  ;;  %s292_s23 = scalar_lea.vmem [#allocation10], %s1604_s27 }
 0x599   : > { %s1488_s13 = scalar_lea.hbm %s2635_s5, %s1669_s16  ;;  %s1489_s14 = sshll.u32 %s292_s23, 4  ;;  %s1490_s14 = int_to_ptr.vmem [resolvable:$true] %s1489_s14 }
 0x59a   : > { %s1491_s15 = sshll.u32 %s1488_s13, 4  ;;  %s1492_s15 = int_to_ptr.hbm [resolvable:$true] %s1491_s15 }
 0x59b   : > { %s2003_s8 = sshra.s32 %s1492_s15, 4  ;;  %s2004_s8 = int_to_ptr.hbm [resolvable:$true] %s2003_s8 }
 0x59c   : > { %s2005_s22 = scalar_lea.hbm %s2004_s8, 16  ;;  %p2010_p11 = scmp.lt.s32.totalorder %s2004_s8, %s2635_s5 }
 0x59d   : > { %p2006_p1 = scmp.ne.s32.totalorder %s2004_s8, %s2005_s22  ;;  %p2011_p9 = scmp.lt.s32.totalorder %s2009_s29, %s2005_s22 }
 0x59f   : > { %p2007_p4 = pnand %p2006_p1, %p2203_p3  ;;  %p2012_p2 = por %p2011_p9, %p2010_p11 }
 0x5a1   : > { %p2008_p8 = pneg %p2007_p4 }
 0x5a3   : > { %p2013_p10 = pnand %p2012_p2, %p2008_p8 }
 0x5ad   : > { %v1401_v10 = vpop.permute.xlu2 %1400 }
 0x5b5   : > { %v1361_v15 = vpop.permute.xlu2 %1360 }
 0x5b6   : > { %v1414_v21 = vsel %vm376_vm1, %v2396_v42, %v1361_v15 }
 0x5b7   : > { %v1416_v23 = vsel %vm408_vm2, %v1414_v21, %v1369_v12 }
 0x5bd   : > { %v1363_v16 = vpop.permute.xlu2 %1362 }
 0x5be   : > { %v1415_v42 = vsel %vm376_vm1, %v2398_v27, %v1363_v16 }
 0x5bf   : > { %v1417_v39 = vsel %vm408_vm2, %v1415_v42, %v1371_v20 }
 0x5c5   : > { %v1377_v22 = vpop.permute.xlu2 %1376 }
 0x5c6   : > { %v1419_v4 = vsel %vm1418_vm15, %v1416_v23, %v1377_v22 }
 0x5c7   : > { %v1422_v33 = vsel %vm1421_vm3, %v1419_v4, %v1385_v30 }
 0x5cb   : > { %v1379_v19 = vpop.permute.xlu0 %1378 }
 0x5cc   : > { %v1420_v7 = vsel %vm1418_vm15, %v1417_v39, %v1379_v19 }
 0x5cd   : > { %v1387_v38 = vpop.permute.xlu2 %1386 }
 0x5ce   : > { %v1423_v40 = vsel %vm1421_vm3, %v1420_v7, %v1387_v38 }
 0x5d3   : > { %v1393_v25 = vpop.permute.xlu1 %1392 }
 0x5d4   : > { %v1425_v35 = vsel %vm1424_vm4, %v1422_v33, %v1393_v25 }
 0x5d5   : > { %v1428_v54 = vsel %vm1427_vm5, %v1425_v35, %v1401_v10 }
 0x5f2   : > { %v1411_v28 = vpop.permute.xlu2 %1410 }
 0x5f4   : > { %v1403_v18 = vpop.permute.xlu0 %1402 }
 0x602   : > { %v1409_v14 = vpop.permute.xlu1 %1408 }
 0x603   : > { %v1431_v61 = vsel %vm1430_vm6, %v1428_v54, %v1409_v14 }
 0x604   : > { %1661 = vmatmul.msk.f32.vlgmr.msra.gmra.mxu0 %vm317_vm0, %v1431_v61 }
 0x60a   : > { %v1395_v41 = vpop.permute.xlu1 %1394 }
 0x60b   : > { %v1426_v56 = vsel %vm1424_vm4, %v1423_v40, %v1395_v41 }
 0x60c   : > { %v1429_v27 = vsel %vm1427_vm5, %v1426_v56, %v1403_v18 }
 0x60d   : > { %v1432_v43 = vsel %vm1430_vm6, %v1429_v27, %v1411_v28 }
 0x60e   : > { %1662 = vmatmul.msk.f32.gmra.mxu0 %vm317_vm0, %v1432_v43 }
 0x681   : > { %v1468_v36 = vpop.f32.mrf.mxu0 }
 0x682   : > { %v1469_v46 = vadd.f32 %v1804_v45, %v1468_v36 }
 0x684   : > { %1474 = vst.msk [vmem:[%s292_s23] sm:$0xff] %vm317_vm0, %v1469_v46 }
 0x68b   : > { %v1471_v47 = vpop.f32.mrf.mxu0 }
 0x68c   : > { %v1472_v49 = vadd.f32 %v1804_v45, %v1471_v47 }
 0x68e   : > { %1475 = vst.msk [vmem:[%s292_s23 + $0x8] sm:$0xff] %vm317_vm0, %v1472_v49 }
 0x68f   : > { %2016 = shalt.err (!%p2013_p10)
}
 0x690   : > { %s2087_s17 = smov 128  }
 0x691   : > { %1686 = dma.vmem_to_hbm [thread:$0]  (%p2203_p3), %s1490_s14, 256, %s1492_s15, %s1477_s7, %s2087_s17, %s2087_s17, %s2080_s12  }
 0x692 PF: > { %s1506_s16 = sand.u32 1, %s2051_s18   ;;  %p2646_p12 = scmp.ge.s32.totalorder %s2063_s21, 2 }
 0x693   : > { %s1507_s23 = scalar_lea.sflag [#allocation4], %s1506_s16 }
 0x694   : > { %p1703_p13 = pnand %p2646_p12, %p2153_p6 }
 0x696   : > { %p1704_p0 = pneg %p1703_p13 }
 0x698   : > { %2046 = dma.done.wait (%p1704_p0), %s1507_s23, 256  }
 0x699   : > { %2048 = vsyncadd (%p1704_p0), %s1507_s23, 4294967040  ;;  %p20_p5 = scmp.ge.s32.totalorder %s2190_s30, 4   ;;  %s2647_s18 = smov %s2055_s19 }
 0x69a   : > { %s2648_s19 = smov %s2059_s20  ;;  %s2649_s20 = smov %s2199_s9 }
 0x69b   : > { %s2650_s21 = smov %s2190_s30  ;;  %22 = sbr.rel (!%p20_p5) target bundleno = 7 (0x7), region = 97 }
 0x6a0   :  { %1513 = vsyncpa [#allocation3], 1 }
 0x6a1   :  { %1515 = vsyncpa [#allocation3 + $0x1], 1 }
 0x6a2   :  { %1516 = vsyncpa [#allocation6], 1 }
 0x6a3   :  { %1517 = vsyncpa [#allocation9], 1 }
 0x6a4   :  { %1518 = vsyncpa [#allocation4], 1 }
 0x6a5   :  { %1520 = vsyncpa [#allocation4 + $0x1], 1 }

</bundles_post_ra>
